<compile_context>
chip_gen: v6e
topology: v6e:2x2x1
jax: 0.10.0
libtpu: 0.0.40
codegen_flags: <defaults>
</compile_context>

<pallas_src>
import functools

import jax
import jax.numpy as jnp
from jax import lax
from jax.experimental import pallas as pl
from jax.experimental.pallas import tpu as pltpu


_EPS = 1e-6  # matches nn.LayerNorm(dim, eps=1e-06) in the reference Block


def _layernorm(x, g, b):
    # x: (T, D); g, b: (1, D)
    mu = jnp.mean(x, axis=-1, keepdims=True)
    var = jnp.mean(jnp.square(x - mu), axis=-1, keepdims=True)
    return (x - mu) * lax.rsqrt(var + _EPS) * g + b


def _gelu_exact(x):
    # nn.GELU() default = exact erf formulation (kept exact for torch parity).
    return 0.5 * x * (1.0 + lax.erf(x * 0.7071067811865476))


# --------------- Kernel 1: LayerNorm1 + merged QKV projection ---------------
def _ln_qkv_kernel(x_ref, g1_ref, b1_ref, wqkv_ref, bqkv_ref, qkv_ref):
    xn = _layernorm(x_ref[...], g1_ref[...], b1_ref[...])
    qkv = jnp.dot(xn, wqkv_ref[...], preferred_element_type=jnp.float32) + bqkv_ref[...]
    qkv_ref[...] = qkv.astype(qkv_ref.dtype)


# --------------- Kernel 2: attention + proj + residual + LN2 + MLP + residual ---------------
def _attn_proj_mlp_kernel(scale, x_ref, q_ref, k_ref, v_ref,
                          wprojh_ref, bproj_ref, g2_ref, b2_ref,
                          wfc1_ref, bfc1_ref, wfc2_ref, bfc2_ref, o_ref):
    # q/k/v refs: (H, T, hd) with the head axis leading -> one batched MXU
    # contraction per op (no per-head loop, no concat, no explicit .T).
    q = q_ref[...] * scale                                     # fold scale into q
    s = jnp.einsum('hqd,hkd->hqk', q, k_ref[...],
                   preferred_element_type=jnp.float32)         # (H, T, T)
    s = s - jnp.max(s, axis=-1, keepdims=True)
    e = jnp.exp(s)
    denom = jnp.sum(e, axis=-1, keepdims=True)
    attn = e * pl.reciprocal(denom, approx=True)               # EUP reciprocal
    ctx = jnp.einsum('hqk,hkd->hqd', attn.astype(v_ref.dtype), v_ref[...],
                     preferred_element_type=jnp.float32)       # (H, T, hd)

    # Head merge + output projection as one head-batched contraction:
    #   out = sum_h ctx[h] @ Wproj[h],  Wproj pre-reshaped to (H, hd, D).
    # No (H,T,hd)->(T,D) relayout/transpose and no ctx HBM round-trip.
    proj = jnp.einsum('htd,hde->hte', ctx, wprojh_ref[...],
                      preferred_element_type=jnp.float32)      # (H, T, D)
    attn_out = jnp.sum(proj, axis=0) + bproj_ref[...]          # (T, D)

    x1 = x_ref[...] + attn_out                                 # residual 1

    xn2 = _layernorm(x1, g2_ref[...], b2_ref[...])
    h1 = _gelu_exact(jnp.dot(xn2, wfc1_ref[...],
                             preferred_element_type=jnp.float32) + bfc1_ref[...])
    h2 = jnp.dot(h1, wfc2_ref[...], preferred_element_type=jnp.float32) + bfc2_ref[...]
    o_ref[...] = (x1 + h2).astype(o_ref.dtype)                 # residual 2


def _const_spec(a):
    # Full-array block with a constant index map: weight stays resident in VMEM
    # across the (parallel) batch grid.
    nd = a.ndim
    return pl.BlockSpec(a.shape, lambda b, _nd=nd: (0,) * _nd)


def block_forward(x, params, n_heads):
    B, T, D = x.shape
    H = n_heads
    hd = D // H
    scale = hd ** (-0.5)

    cparams = pltpu.CompilerParams(
        dimension_semantics=("parallel",),
        vmem_limit_bytes=64 * 1024 * 1024,
    )

    # ---- Kernel 1: LayerNorm1 + merged QKV projection ----
    w_a = [params[k] for k in ('g1', 'b1', 'wqkv', 'bqkv')]
    qkv = pl.pallas_call(
        _ln_qkv_kernel,
        out_shape=jax.ShapeDtypeStruct((B, T, 3 * D), x.dtype),
        grid=(B,),
        in_specs=[pl.BlockSpec((None, T, D), lambda b: (b, 0, 0))]
                 + [_const_spec(a) for a in w_a],
        out_specs=pl.BlockSpec((None, T, 3 * D), lambda b: (b, 0, 0)),
        compiler_params=cparams,
    )(x, *w_a)

    # ---- head split: wrapper-side layout plumbing (== torch reshape+permute) ----
    qkv5 = qkv.reshape(B, T, 3, H, hd)
    q = jnp.transpose(qkv5[:, :, 0], (0, 2, 1, 3))  # (B, H, T, hd)
    k = jnp.transpose(qkv5[:, :, 1], (0, 2, 1, 3))
    v = jnp.transpose(qkv5[:, :, 2], (0, 2, 1, 3))

    # Per-head projection weight view: rows of Wproj are ordered (h, hd).
    wproj_h = params['wproj'].reshape(H, hd, D)

    # ---- Kernel 2: attention + proj + residual + LN2 + MLP + residual ----
    w_c = [wproj_h] + [params[k] for k in ('bproj', 'g2', 'b2',
                                           'wfc1', 'bfc1', 'wfc2', 'bfc2')]
    out = pl.pallas_call(
        functools.partial(_attn_proj_mlp_kernel, scale),
        out_shape=jax.ShapeDtypeStruct((B, T, D), x.dtype),
        grid=(B,),
        in_specs=[pl.BlockSpec((None, T, D), lambda b: (b, 0, 0))]
                 + [pl.BlockSpec((None, H, T, hd), lambda b: (b, 0, 0, 0))] * 3
                 + [_const_spec(a) for a in w_c],
        out_specs=pl.BlockSpec((None, T, D), lambda b: (b, 0, 0)),
        compiler_params=cparams,
    )(x, q, k, v, *w_c)
    return out


def block_reference(x, params, n_heads):
    """Pure-JAX reference matching the PyTorch Block forward."""
    B, T, D = x.shape
    H = n_heads
    hd = D // H
    scale = hd ** (-0.5)

    def ln(v, g, b):
        mu = jnp.mean(v, -1, keepdims=True)
        var = jnp.mean((v - mu) ** 2, -1, keepdims=True)
        return (v - mu) / jnp.sqrt(var + _EPS) * g + b

    xn = ln(x, params['g1'], params['b1'])
    qkv = xn @ params['wqkv'] + params['bqkv']
    qkv = jnp.transpose(qkv.reshape(B, T, 3, H, hd), (2, 0, 3, 1, 4))
    q, k, v = qkv[0], qkv[1], qkv[2]
    attn = jax.nn.softmax((q @ jnp.swapaxes(k, -1, -2)) * scale, axis=-1)
    ctx = jnp.transpose(attn @ v, (0, 2, 1, 3)).reshape(B, T, D)
    x1 = x + ctx @ params['wproj'] + params['bproj']
    xn2 = ln(x1, params['g2'], params['b2'])
    h = jax.nn.gelu(xn2 @ params['wfc1'] + params['bfc1'], approximate=False)
    return x1 + h @ params['wfc2'] + params['bfc2']


def init_params(key, dim, mlp_ratio=3.0, dtype=jnp.float32):
    hidden = int(dim * mlp_ratio)
    ks = jax.random.split(key, 8)
    std = 0.02

    def nrm(k, shape):
        return (jax.random.normal(k, shape, dtype=jnp.float32) * std).astype(dtype)

    return {
        # LayerNorm1 (PyTorch init: weight=1, bias=0)
        'g1': jnp.ones((1, dim), dtype),
        'b1': jnp.zeros((1, dim), dtype),
        # qkv: torch weight (3*dim, dim) -> stored transposed (dim, 3*dim)
        'wqkv': nrm(ks[0], (dim, 3 * dim)),
        'bqkv': nrm(ks[1], (1, 3 * dim)),
        # proj
        'wproj': nrm(ks[2], (dim, dim)),
        'bproj': nrm(ks[3], (1, dim)),
        # LayerNorm2
        'g2': jnp.ones((1, dim), dtype),
        'b2': jnp.zeros((1, dim), dtype),
        # MLP
        'wfc1': nrm(ks[4], (dim, hidden)),
        'bfc1': nrm(ks[5], (1, hidden)),
        'wfc2': nrm(ks[6], (hidden, dim)),
        'bfc2': nrm(ks[7], (1, dim)),
    }


if __name__ == "__main__":
    # Small shapes consistent with Block's forward (n_samples, n_patches+1, dim),
    # with dim / 3*dim / hidden chosen as multiples of 128 for lane-dense tiles.
    B, T, D = 2, 16, 128
    N_HEADS = 4
    MLP_RATIO = 3.0

    key = jax.random.PRNGKey(0)
    kx, kp = jax.random.split(key)
    x = jax.random.normal(kx, (B, T, D), dtype=jnp.float32)
    params = init_params(kp, D, MLP_RATIO)

    fwd = jax.jit(block_forward, static_argnames=('n_heads',))
    out = fwd(x, params, n_heads=N_HEADS)
    jax.block_until_ready(out)

    assert out.shape == (B, T, D), out.shape
    assert bool(jnp.all(jnp.isfinite(out)))

    ref = block_reference(x, params, N_HEADS)
    max_err = float(jnp.max(jnp.abs(out - ref)))
    assert max_err < 5e-2, f"max abs error vs reference: {max_err}"

    print("KERNEL_OK")
</pallas_src>

<mosaic_0001>
module attributes {stable_mosaic.version = 11 : i64} {
  func.func @_ln_qkv_kernel(%arg0: i32, %arg1: memref<1x16x128xf32, #tpu.memory_space<vmem>>, %arg2: memref<1x128xf32, #tpu.memory_space<vmem>>, %arg3: memref<1x128xf32, #tpu.memory_space<vmem>>, %arg4: memref<128x384xf32, #tpu.memory_space<vmem>>, %arg5: memref<1x384xf32, #tpu.memory_space<vmem>>, %arg6: memref<1x16x384xf32, #tpu.memory_space<vmem>>) attributes {dimension_semantics = [#tpu.dimension_semantics<parallel>], iteration_bounds = array<i64: 2>, scalar_prefetch = 0 : i64, scratch_operands = 0 : i64, tpu.core_type = #tpu.core_type<tc>, window_params = [{transform_indices = @transform_0, window_bounds = array<i64: 1, 16, 128>}, {pipeline_mode = #tpu.pipeline_mode<synchronous>, transform_indices = @transform_1, window_bounds = array<i64: 1, 128>}, {pipeline_mode = #tpu.pipeline_mode<synchronous>, transform_indices = @transform_2, window_bounds = array<i64: 1, 128>}, {pipeline_mode = #tpu.pipeline_mode<synchronous>, transform_indices = @transform_3, window_bounds = array<i64: 128, 384>}, {pipeline_mode = #tpu.pipeline_mode<synchronous>, transform_indices = @transform_4, window_bounds = array<i64: 1, 384>}, {transform_indices = @transform_5, window_bounds = array<i64: 1, 16, 384>}]} {
    %c0 = arith.constant 0 : index
    %c0_0 = arith.constant 0 : index
    %c0_1 = arith.constant 0 : index
    %0 = vector.load %arg1[%c0, %c0_0, %c0_1] : memref<1x16x128xf32, #tpu.memory_space<vmem>>, vector<1x16x128xf32>
    %1 = vector.shape_cast %0 : vector<1x16x128xf32> to vector<16x128xf32>
    %c0_2 = arith.constant 0 : index
    %c0_3 = arith.constant 0 : index
    %2 = vector.load %arg2[%c0_2, %c0_3] : memref<1x128xf32, #tpu.memory_space<vmem>>, vector<1x128xf32>
    %c0_4 = arith.constant 0 : index
    %c0_5 = arith.constant 0 : index
    %3 = vector.load %arg3[%c0_4, %c0_5] : memref<1x128xf32, #tpu.memory_space<vmem>>, vector<1x128xf32>
    %cst = arith.constant dense<0.000000e+00> : vector<16xf32>
    %4 = vector.multi_reduction <add>, %1, %cst [1] : vector<16x128xf32> to vector<16xf32>
    %5 = vector.shape_cast %4 : vector<16xf32> to vector<16x1xf32>
    %cst_6 = arith.constant 1.280000e+02 : f32
    %6 = vector.broadcast %cst_6 : f32 to vector<16x1xf32>
    %7 = arith.divf %5, %6 : vector<16x1xf32>
    %8 = vector.broadcast %7 : vector<16x1xf32> to vector<16x128xf32>
    %9 = arith.subf %1, %8 : vector<16x128xf32>
    %10 = arith.mulf %9, %9 : vector<16x128xf32>
    %cst_7 = arith.constant dense<0.000000e+00> : vector<16xf32>
    %11 = vector.multi_reduction <add>, %10, %cst_7 [1] : vector<16x128xf32> to vector<16xf32>
    %12 = vector.shape_cast %11 : vector<16xf32> to vector<16x1xf32>
    %cst_8 = arith.constant 1.280000e+02 : f32
    %13 = vector.broadcast %cst_8 : f32 to vector<16x1xf32>
    %14 = arith.divf %12, %13 : vector<16x1xf32>
    %15 = vector.broadcast %7 : vector<16x1xf32> to vector<16x128xf32>
    %16 = arith.subf %1, %15 : vector<16x128xf32>
    %cst_9 = arith.constant 9.99999997E-7 : f32
    %17 = vector.broadcast %cst_9 : f32 to vector<16x1xf32>
    %18 = arith.addf %14, %17 : vector<16x1xf32>
    %19 = math.rsqrt %18 : vector<16x1xf32>
    %20 = vector.broadcast %19 : vector<16x1xf32> to vector<16x128xf32>
    %21 = arith.mulf %16, %20 : vector<16x128xf32>
    %22 = vector.broadcast %2 : vector<1x128xf32> to vector<16x128xf32>
    %23 = arith.mulf %21, %22 : vector<16x128xf32>
    %24 = vector.broadcast %3 : vector<1x128xf32> to vector<16x128xf32>
    %25 = arith.addf %23, %24 : vector<16x128xf32>
    %c0_10 = arith.constant 0 : index
    %c0_11 = arith.constant 0 : index
    %26 = vector.load %arg4[%c0_10, %c0_11] : memref<128x384xf32, #tpu.memory_space<vmem>>, vector<128x384xf32>
    %cst_12 = arith.constant dense<0.000000e+00> : vector<16x384xf32>
    %27 = tpu.matmul %25, %26, %cst_12 {dimension_numbers = #tpu.dot_dimension_numbers<[1], [0], [0], [1], [0, 0, 1, 1], [], []>} : vector<16x128xf32>, vector<128x384xf32>, vector<16x384xf32> -> vector<16x384xf32>
    %c0_13 = arith.constant 0 : index
    %c0_14 = arith.constant 0 : index
    %28 = vector.load %arg5[%c0_13, %c0_14] : memref<1x384xf32, #tpu.memory_space<vmem>>, vector<1x384xf32>
    %29 = vector.broadcast %28 : vector<1x384xf32> to vector<16x384xf32>
    %30 = arith.addf %27, %29 : vector<16x384xf32>
    %c0_15 = arith.constant 0 : index
    %c0_16 = arith.constant 0 : index
    %c0_17 = arith.constant 0 : index
    %31 = vector.load %arg6[%c0_15, %c0_16, %c0_17] : memref<1x16x384xf32, #tpu.memory_space<vmem>>, vector<1x16x384xf32>
    %32 = vector.shape_cast %31 : vector<1x16x384xf32> to vector<16x384xf32>
    %33 = vector.shape_cast %30 : vector<16x384xf32> to vector<1x16x384xf32>
    tpu.vector_store %arg6[%c0_15, %c0_16, %c0_17], %33 {strides = array<i32>} : memref<1x16x384xf32, #tpu.memory_space<vmem>>, vector<1x16x384xf32>,
    return
  }
  func.func @transform_0(%arg0: i32) -> (i32, i32, i32) {
    %c0_i32 = arith.constant 0 : i32
    %c0_i32_0 = arith.constant 0 : i32
    %c0_i32_1 = arith.constant 0 : i32
    return %arg0, %c0_i32, %c0_i32_0 : i32, i32, i32
  }
  func.func @transform_1(%arg0: i32) -> (i32, i32) {
    %c0_i32 = arith.constant 0 : i32
    %c0_i32_0 = arith.constant 0 : i32
    %c0_i32_1 = arith.constant 0 : i32
    return %c0_i32, %c0_i32_0 : i32, i32
  }
  func.func @transform_2(%arg0: i32) -> (i32, i32) {
    %c0_i32 = arith.constant 0 : i32
    %c0_i32_0 = arith.constant 0 : i32
    %c0_i32_1 = arith.constant 0 : i32
    return %c0_i32, %c0_i32_0 : i32, i32
  }
  func.func @transform_3(%arg0: i32) -> (i32, i32) {
    %c0_i32 = arith.constant 0 : i32
    %c0_i32_0 = arith.constant 0 : i32
    %c0_i32_1 = arith.constant 0 : i32
    return %c0_i32, %c0_i32_0 : i32, i32
  }
  func.func @transform_4(%arg0: i32) -> (i32, i32) {
    %c0_i32 = arith.constant 0 : i32
    %c0_i32_0 = arith.constant 0 : i32
    %c0_i32_1 = arith.constant 0 : i32
    return %c0_i32, %c0_i32_0 : i32, i32
  }
  func.func @transform_5(%arg0: i32) -> (i32, i32, i32) {
    %c0_i32 = arith.constant 0 : i32
    %c0_i32_0 = arith.constant 0 : i32
    %c0_i32_1 = arith.constant 0 : i32
    return %arg0, %c0_i32, %c0_i32_0 : i32, i32, i32
  }
}

module attributes {stable_mosaic.version = 11 : i64} {
  func.func @_attn_proj_mlp_kernel(%arg0: i32, %arg1: memref<1x16x128xf32, #tpu.memory_space<vmem>>, %arg2: memref<1x4x16x32xf32, #tpu.memory_space<vmem>>, %arg3: memref<1x4x16x32xf32, #tpu.memory_space<vmem>>, %arg4: memref<1x4x16x32xf32, #tpu.memory_space<vmem>>, %arg5: memref<4x32x128xf32, #tpu.memory_space<vmem>>, %arg6: memref<1x128xf32, #tpu.memory_space<vmem>>, %arg7: memref<1x128xf32, #tpu.memory_space<vmem>>, %arg8: memref<1x128xf32, #tpu.memory_space<vmem>>, %arg9: memref<128x384xf32, #tpu.memory_space<vmem>>, %arg10: memref<1x384xf32, #tpu.memory_space<vmem>>, %arg11: memref<384x128xf32, #tpu.memory_space<vmem>>, %arg12: memref<1x128xf32, #tpu.memory_space<vmem>>, %arg13: memref<1x16x128xf32, #tpu.memory_space<vmem>>) attributes {dimension_semantics = [#tpu.dimension_semantics<parallel>], iteration_bounds = array<i64: 2>, scalar_prefetch = 0 : i64, scratch_operands = 0 : i64, tpu.core_type = #tpu.core_type<tc>, window_params = [{transform_indices = @transform_0, window_bounds = array<i64: 1, 16, 128>}, {transform_indices = @transform_1, window_bounds = array<i64: 1, 4, 16, 32>}, {transform_indices = @transform_2, window_bounds = array<i64: 1, 4, 16, 32>}, {transform_indices = @transform_3, window_bounds = array<i64: 1, 4, 16, 32>}, {pipeline_mode = #tpu.pipeline_mode<synchronous>, transform_indices = @transform_4, window_bounds = array<i64: 4, 32, 128>}, {pipeline_mode = #tpu.pipeline_mode<synchronous>, transform_indices = @transform_5, window_bounds = array<i64: 1, 128>}, {pipeline_mode = #tpu.pipeline_mode<synchronous>, transform_indices = @transform_6, window_bounds = array<i64: 1, 128>}, {pipeline_mode = #tpu.pipeline_mode<synchronous>, transform_indices = @transform_7, window_bounds = array<i64: 1, 128>}, {pipeline_mode = #tpu.pipeline_mode<synchronous>, transform_indices = @transform_8, window_bounds = array<i64: 128, 384>}, {pipeline_mode = #tpu.pipeline_mode<synchronous>, transform_indices = @transform_9, window_bounds = array<i64: 1, 384>}, {pipeline_mode = #tpu.pipeline_mode<synchronous>, transform_indices = @transform_10, window_bounds = array<i64: 384, 128>}, {pipeline_mode = #tpu.pipeline_mode<synchronous>, transform_indices = @transform_11, window_bounds = array<i64: 1, 128>}, {transform_indices = @transform_12, window_bounds = array<i64: 1, 16, 128>}]} {
    %c0 = arith.constant 0 : index
    %c0_0 = arith.constant 0 : index
    %c0_1 = arith.constant 0 : index
    %c0_2 = arith.constant 0 : index
    %0 = vector.load %arg2[%c0, %c0_0, %c0_1, %c0_2] : memref<1x4x16x32xf32, #tpu.memory_space<vmem>>, vector<1x4x16x32xf32>
    %1 = vector.shape_cast %0 : vector<1x4x16x32xf32> to vector<4x16x32xf32>
    %cst = arith.constant 0.176776692 : f32
    %2 = vector.broadcast %cst : f32 to vector<4x16x32xf32>
    %3 = arith.mulf %1, %2 : vector<4x16x32xf32>
    %c0_3 = arith.constant 0 : index
    %c0_4 = arith.constant 0 : index
    %c0_5 = arith.constant 0 : index
    %c0_6 = arith.constant 0 : index
    %4 = vector.load %arg3[%c0_3, %c0_4, %c0_5, %c0_6] : memref<1x4x16x32xf32, #tpu.memory_space<vmem>>, vector<1x4x16x32xf32>
    %5 = vector.shape_cast %4 : vector<1x4x16x32xf32> to vector<4x16x32xf32>
    "tpu.trace_start"() <{level = 10 : i32, message = "hqd,hkd->hqk"}> : () -> ()
    %cst_7 = arith.constant dense<0.000000e+00> : vector<4x16x16xf32>
    %6 = tpu.matmul %3, %5, %cst_7 {dimension_numbers = #tpu.dot_dimension_numbers<[2], [2], [1], [1], [0, 0, 0, 1, 1, 1], [0], [0]>} : vector<4x16x32xf32>, vector<4x16x32xf32>, vector<4x16x16xf32> -> vector<4x16x16xf32>
    "tpu.trace_stop"() : () -> ()
    %cst_8 = arith.constant dense<0xFF800000> : vector<4x16xf32>
    %7 = vector.multi_reduction <maximumf>, %6, %cst_8 [2] : vector<4x16x16xf32> to vector<4x16xf32>
    %8 = vector.shape_cast %7 : vector<4x16xf32> to vector<4x16x1xf32>
    %9 = vector.broadcast %8 : vector<4x16x1xf32> to vector<4x16x16xf32>
    %10 = arith.subf %6, %9 : vector<4x16x16xf32>
    %11 = math.exp %10 : vector<4x16x16xf32>
    %cst_9 = arith.constant dense<0.000000e+00> : vector<4x16xf32>
    %12 = vector.multi_reduction <add>, %11, %cst_9 [2] : vector<4x16x16xf32> to vector<4x16xf32>
    %13 = vector.shape_cast %12 : vector<4x16xf32> to vector<4x16x1xf32>
    %14 = tpu.reciprocal %13 {approx = true} : vector<4x16x1xf32> -> vector<4x16x1xf32>
    %15 = vector.broadcast %14 : vector<4x16x1xf32> to vector<4x16x16xf32>
    %16 = arith.mulf %11, %15 : vector<4x16x16xf32>
    %c0_10 = arith.constant 0 : index
    %c0_11 = arith.constant 0 : index
    %c0_12 = arith.constant 0 : index
    %c0_13 = arith.constant 0 : index
    %17 = vector.load %arg4[%c0_10, %c0_11, %c0_12, %c0_13] : memref<1x4x16x32xf32, #tpu.memory_space<vmem>>, vector<1x4x16x32xf32>
    %18 = vector.shape_cast %17 : vector<1x4x16x32xf32> to vector<4x16x32xf32>
    "tpu.trace_start"() <{level = 10 : i32, message = "hqk,hkd->hqd"}> : () -> ()
    %cst_14 = arith.constant dense<0.000000e+00> : vector<4x16x32xf32>
    %19 = tpu.matmul %16, %18, %cst_14 {dimension_numbers = #tpu.dot_dimension_numbers<[2], [1], [1], [2], [0, 0, 0, 1, 1, 2], [0], [0]>} : vector<4x16x16xf32>, vector<4x16x32xf32>, vector<4x16x32xf32> -> vector<4x16x32xf32>
    "tpu.trace_stop"() : () -> ()
    %c0_15 = arith.constant 0 : index
    %c0_16 = arith.constant 0 : index
    %c0_17 = arith.constant 0 : index
    %20 = vector.load %arg5[%c0_15, %c0_16, %c0_17] : memref<4x32x128xf32, #tpu.memory_space<vmem>>, vector<4x32x128xf32>
    "tpu.trace_start"() <{level = 10 : i32, message = "htd,hde->hte"}> : () -> ()
    %cst_18 = arith.constant dense<0.000000e+00> : vector<4x16x128xf32>
    %21 = tpu.matmul %19, %20, %cst_18 {dimension_numbers = #tpu.dot_dimension_numbers<[2], [1], [1], [2], [0, 0, 0, 1, 1, 2], [0], [0]>} : vector<4x16x32xf32>, vector<4x32x128xf32>, vector<4x16x128xf32> -> vector<4x16x128xf32>
    "tpu.trace_stop"() : () -> ()
    %cst_19 = arith.constant dense<0.000000e+00> : vector<16x128xf32>
    %22 = vector.multi_reduction <add>, %21, %cst_19 [0] : vector<4x16x128xf32> to vector<16x128xf32>
    %c0_20 = arith.constant 0 : index
    %c0_21 = arith.constant 0 : index
    %23 = vector.load %arg6[%c0_20, %c0_21] : memref<1x128xf32, #tpu.memory_space<vmem>>, vector<1x128xf32>
    %24 = vector.broadcast %23 : vector<1x128xf32> to vector<16x128xf32>
    %25 = arith.addf %22, %24 : vector<16x128xf32>
    %c0_22 = arith.constant 0 : index
    %c0_23 = arith.constant 0 : index
    %c0_24 = arith.constant 0 : index
    %26 = vector.load %arg1[%c0_22, %c0_23, %c0_24] : memref<1x16x128xf32, #tpu.memory_space<vmem>>, vector<1x16x128xf32>
    %27 = vector.shape_cast %26 : vector<1x16x128xf32> to vector<16x128xf32>
    %28 = arith.addf %27, %25 : vector<16x128xf32>
    %c0_25 = arith.constant 0 : index
    %c0_26 = arith.constant 0 : index
    %29 = vector.load %arg7[%c0_25, %c0_26] : memref<1x128xf32, #tpu.memory_space<vmem>>, vector<1x128xf32>
    %c0_27 = arith.constant 0 : index
    %c0_28 = arith.constant 0 : index
    %30 = vector.load %arg8[%c0_27, %c0_28] : memref<1x128xf32, #tpu.memory_space<vmem>>, vector<1x128xf32>
    %cst_29 = arith.constant dense<0.000000e+00> : vector<16xf32>
    %31 = vector.multi_reduction <add>, %28, %cst_29 [1] : vector<16x128xf32> to vector<16xf32>
    %32 = vector.shape_cast %31 : vector<16xf32> to vector<16x1xf32>
    %cst_30 = arith.constant 1.280000e+02 : f32
    %33 = vector.broadcast %cst_30 : f32 to vector<16x1xf32>
    %34 = arith.divf %32, %33 : vector<16x1xf32>
    %35 = vector.broadcast %34 : vector<16x1xf32> to vector<16x128xf32>
    %36 = arith.subf %28, %35 : vector<16x128xf32>
    %37 = arith.mulf %36, %36 : vector<16x128xf32>
    %cst_31 = arith.constant dense<0.000000e+00> : vector<16xf32>
    %38 = vector.multi_reduction <add>, %37, %cst_31 [1] : vector<16x128xf32> to vector<16xf32>
    %39 = vector.shape_cast %38 : vector<16xf32> to vector<16x1xf32>
    %cst_32 = arith.constant 1.280000e+02 : f32
    %40 = vector.broadcast %cst_32 : f32 to vector<16x1xf32>
    %41 = arith.divf %39, %40 : vector<16x1xf32>
    %42 = vector.broadcast %34 : vector<16x1xf32> to vector<16x128xf32>
    %43 = arith.subf %28, %42 : vector<16x128xf32>
    %cst_33 = arith.constant 9.99999997E-7 : f32
    %44 = vector.broadcast %cst_33 : f32 to vector<16x1xf32>
    %45 = arith.addf %41, %44 : vector<16x1xf32>
    %46 = math.rsqrt %45 : vector<16x1xf32>
    %47 = vector.broadcast %46 : vector<16x1xf32> to vector<16x128xf32>
    %48 = arith.mulf %43, %47 : vector<16x128xf32>
    %49 = vector.broadcast %29 : vector<1x128xf32> to vector<16x128xf32>
    %50 = arith.mulf %48, %49 : vector<16x128xf32>
    %51 = vector.broadcast %30 : vector<1x128xf32> to vector<16x128xf32>
    %52 = arith.addf %50, %51 : vector<16x128xf32>
    %c0_34 = arith.constant 0 : index
    %c0_35 = arith.constant 0 : index
    %53 = vector.load %arg9[%c0_34, %c0_35] : memref<128x384xf32, #tpu.memory_space<vmem>>, vector<128x384xf32>
    %cst_36 = arith.constant dense<0.000000e+00> : vector<16x384xf32>
    %54 = tpu.matmul %52, %53, %cst_36 {dimension_numbers = #tpu.dot_dimension_numbers<[1], [0], [0], [1], [0, 0, 1, 1], [], []>} : vector<16x128xf32>, vector<128x384xf32>, vector<16x384xf32> -> vector<16x384xf32>
    %c0_37 = arith.constant 0 : index
    %c0_38 = arith.constant 0 : index
    %55 = vector.load %arg10[%c0_37, %c0_38] : memref<1x384xf32, #tpu.memory_space<vmem>>, vector<1x384xf32>
    %56 = vector.broadcast %55 : vector<1x384xf32> to vector<16x384xf32>
    %57 = arith.addf %54, %56 : vector<16x384xf32>
    %cst_39 = arith.constant 5.000000e-01 : f32
    %58 = vector.broadcast %cst_39 : f32 to vector<16x384xf32>
    %59 = arith.mulf %58, %57 : vector<16x384xf32>
    %cst_40 = arith.constant 0.707106769 : f32
    %60 = vector.broadcast %cst_40 : f32 to vector<16x384xf32>
    %61 = arith.mulf %57, %60 : vector<16x384xf32>
    %62 = math.erf %61 : vector<16x384xf32>
    %cst_41 = arith.constant 1.000000e+00 : f32
    %63 = vector.broadcast %cst_41 : f32 to vector<16x384xf32>
    %64 = arith.addf %63, %62 : vector<16x384xf32>
    %65 = arith.mulf %59, %64 : vector<16x384xf32>
    %c0_42 = arith.constant 0 : index
    %c0_43 = arith.constant 0 : index
    %66 = vector.load %arg11[%c0_42, %c0_43] : memref<384x128xf32, #tpu.memory_space<vmem>>, vector<384x128xf32>
    %cst_44 = arith.constant dense<0.000000e+00> : vector<16x128xf32>
    %67 = tpu.matmul %65, %66, %cst_44 {dimension_numbers = #tpu.dot_dimension_numbers<[1], [0], [0], [1], [0, 0, 1, 1], [], []>} : vector<16x384xf32>, vector<384x128xf32>, vector<16x128xf32> -> vector<16x128xf32>
    %c0_45 = arith.constant 0 : index
    %c0_46 = arith.constant 0 : index
    %68 = vector.load %arg12[%c0_45, %c0_46] : memref<1x128xf32, #tpu.memory_space<vmem>>, vector<1x128xf32>
    %69 = vector.broadcast %68 : vector<1x128xf32> to vector<16x128xf32>
    %70 = arith.addf %67, %69 : vector<16x128xf32>
    %71 = arith.addf %28, %70 : vector<16x128xf32>
    %c0_47 = arith.constant 0 : index
    %c0_48 = arith.constant 0 : index
    %c0_49 = arith.constant 0 : index
    %72 = vector.load %arg13[%c0_47, %c0_48, %c0_49] : memref<1x16x128xf32, #tpu.memory_space<vmem>>, vector<1x16x128xf32>
    %73 = vector.shape_cast %72 : vector<1x16x128xf32> to vector<16x128xf32>
    %74 = vector.shape_cast %71 : vector<16x128xf32> to vector<1x16x128xf32>
    tpu.vector_store %arg13[%c0_47, %c0_48, %c0_49], %74 {strides = array<i32>} : memref<1x16x128xf32, #tpu.memory_space<vmem>>, vector<1x16x128xf32>,
    return
  }
  func.func @transform_0(%arg0: i32) -> (i32, i32, i32) {
    %c0_i32 = arith.constant 0 : i32
    %c0_i32_0 = arith.constant 0 : i32
    %c0_i32_1 = arith.constant 0 : i32
    return %arg0, %c0_i32, %c0_i32_0 : i32, i32, i32
  }
  func.func @transform_1(%arg0: i32) -> (i32, i32, i32, i32) {
    %c0_i32 = arith.constant 0 : i32
    %c0_i32_0 = arith.constant 0 : i32
    %c0_i32_1 = arith.constant 0 : i32
    %c0_i32_2 = arith.constant 0 : i32
    return %arg0, %c0_i32, %c0_i32_0, %c0_i32_1 : i32, i32, i32, i32
  }
  func.func @transform_2(%arg0: i32) -> (i32, i32, i32, i32) {
    %c0_i32 = arith.constant 0 : i32
    %c0_i32_0 = arith.constant 0 : i32
    %c0_i32_1 = arith.constant 0 : i32
    %c0_i32_2 = arith.constant 0 : i32
    return %arg0, %c0_i32, %c0_i32_0, %c0_i32_1 : i32, i32, i32, i32
  }
  func.func @transform_3(%arg0: i32) -> (i32, i32, i32, i32) {
    %c0_i32 = arith.constant 0 : i32
    %c0_i32_0 = arith.constant 0 : i32
    %c0_i32_1 = arith.constant 0 : i32
    %c0_i32_2 = arith.constant 0 : i32
    return %arg0, %c0_i32, %c0_i32_0, %c0_i32_1 : i32, i32, i32, i32
  }
  func.func @transform_4(%arg0: i32) -> (i32, i32, i32) {
    %c0_i32 = arith.constant 0 : i32
    %c0_i32_0 = arith.constant 0 : i32
    %c0_i32_1 = arith.constant 0 : i32
    %c0_i32_2 = arith.constant 0 : i32
    return %c0_i32, %c0_i32_0, %c0_i32_1 : i32, i32, i32
  }
  func.func @transform_5(%arg0: i32) -> (i32, i32) {
    %c0_i32 = arith.constant 0 : i32
    %c0_i32_0 = arith.constant 0 : i32
    %c0_i32_1 = arith.constant 0 : i32
    return %c0_i32, %c0_i32_0 : i32, i32
  }
  func.func @transform_6(%arg0: i32) -> (i32, i32) {
    %c0_i32 = arith.constant 0 : i32
    %c0_i32_0 = arith.constant 0 : i32
    %c0_i32_1 = arith.constant 0 : i32
    return %c0_i32, %c0_i32_0 : i32, i32
  }
  func.func @transform_7(%arg0: i32) -> (i32, i32) {
    %c0_i32 = arith.constant 0 : i32
    %c0_i32_0 = arith.constant 0 : i32
    %c0_i32_1 = arith.constant 0 : i32
    return %c0_i32, %c0_i32_0 : i32, i32
  }
  func.func @transform_8(%arg0: i32) -> (i32, i32) {
    %c0_i32 = arith.constant 0 : i32
    %c0_i32_0 = arith.constant 0 : i32
    %c0_i32_1 = arith.constant 0 : i32
    return %c0_i32, %c0_i32_0 : i32, i32
  }
  func.func @transform_9(%arg0: i32) -> (i32, i32) {
    %c0_i32 = arith.constant 0 : i32
    %c0_i32_0 = arith.constant 0 : i32
    %c0_i32_1 = arith.constant 0 : i32
    return %c0_i32, %c0_i32_0 : i32, i32
  }
  func.func @transform_10(%arg0: i32) -> (i32, i32) {
    %c0_i32 = arith.constant 0 : i32
    %c0_i32_0 = arith.constant 0 : i32
    %c0_i32_1 = arith.constant 0 : i32
    return %c0_i32, %c0_i32_0 : i32, i32
  }
  func.func @transform_11(%arg0: i32) -> (i32, i32) {
    %c0_i32 = arith.constant 0 : i32
    %c0_i32_0 = arith.constant 0 : i32
    %c0_i32_1 = arith.constant 0 : i32
    return %c0_i32, %c0_i32_0 : i32, i32
  }
  func.func @transform_12(%arg0: i32) -> (i32, i32, i32) {
    %c0_i32 = arith.constant 0 : i32
    %c0_i32_0 = arith.constant 0 : i32
    %c0_i32_1 = arith.constant 0 : i32
    return %arg0, %c0_i32, %c0_i32_0 : i32, i32, i32
  }
}

</mosaic_0001>

<bundles_post_ra>
// kernel: block_forward.2
= control target key start
LH: loop header
LB: loop body
LE: loop exit
PB: predicated region body
PF: predicated region fallthrough
CT: control target
= control target key end

     0   :  { %10 = vsyncpa [#allocation3], 0  ;;  %s1082_s0 = inlined_call_operand.hbm [shape: f32[2,16,128], index: 0, kind: input, shape index: {}]   ;;  %s1083_s1 = inlined_call_operand.vmem [shape: f32[1,128], index: 1, kind: input, shape index: {}]   ;;  %s1084_s2 = inlined_call_operand.hbm [shape: f32[1,128], index: 2, kind: input, shape index: {}]   ;;  %s1085_s3 = inlined_call_operand.hbm [shape: f32[128,384], index: 3, kind: input, shape index: {}]   ;;  %s1086_s4 = inlined_call_operand.vmem [shape: f32[1,384], index: 4, kind: input, shape index: {}]   ;;  %s1087_s5 = inlined_call_operand.vmem [shape: f32[2,16,384], index: 5, kind: output, shape index: {}]  }
   0x1   :  { %12 = vsyncpa [#allocation3 + $0x1], 0 }
   0x2   :  { %13 = vsyncpa [#allocation5], 0  ;;  %s923_s18 = smov 0   ;;  %s925_s19 = smov 0  }
   0x3   :  { %s927_s20 = smov 0   ;;  %s929_s21 = smov 0  }
   0x4 LB: > { %s942_s22 = sadd.s32 4294967295, %s883_s21   ;;  %s945_s23 = sadd.s32 1, %s883_s21   ;;  %s883_s21 = sphi %s929_s21, %s1105_s21   ;;  %s879_s20 = sphi %s927_s20, %s1104_s20   ;;  %s875_s19 = sphi %s925_s19, %s1103_s19   ;;  %s871_s18 = sphi %s923_s18, %s1102_s18  }
   0x5   : > { %s23_s24 = ssub.s32 %s883_s21, %s945_s23  ;;  %s26_s25 = sadd.s32 1, %s879_s20 }
   0x6   : > { %p24_p0 = scmp.eq.s32.totalorder %s23_s24, 0  ;;  %p33_p1 = scmp.ne.s32.totalorder %s879_s20, %s875_s19 }
   0x7   : > { %p34_p2 = scmp.eq.s32.totalorder %s883_s21, 0  ;;  %p39_p3 = scmp.ne.s32.totalorder %s875_s19, %s871_s18 }
   0x8   : > { %s955_s26 = scalar_select %p24_p0, %s879_s20, %s26_s25  }
   0x9   : > { %p957_p4 = por %p34_p2, %p33_p1  ;;  %p1088_p5 = scmp.eq.s32.totalorder %s942_s22, 0 }
   0xa   : > { %p625_p6 = scmp.ge.s32.totalorder %s883_s21, 1  ;;  %p160_p7 = scmp.lt.s32.totalorder %s883_s21, 3 }
   0xb   : > { %p966_p8 = por %p1088_p5, %p39_p3  ;;  %s885_s30 = smov [#allocation4]  }
   0xc   : > { %p970_p9 = pnand %p625_p6, %p160_p7  ;;  %s176_s6 = sshll.u32 %s885_s30, 4  ;;  %s177_s6 = int_to_ptr.vmem [resolvable:$true] %s176_s6 }
   0xd   : > { %s1093_s28 = scalar_select %p966_p8, 1, 0 }
   0xe   : > { %s1094_s29 = scalar_select %p970_p9, 1, 0 }
   0xf   : > { %p706_p10 = pneg %p970_p9  ;;  %p719_p11 = scmp.lt.s32.totalorder %s883_s21, 2 }
  0x10   : > { %s886_s8 = smov [#allocation6]   ;;  %s776_s11 = scalar_lea.vmem %s177_s6, 16 }
  0x11   : > { %p979_p12 = pnand %p706_p10, %p1088_p5  ;;  %s186_s9 = sshll.u32 %s886_s8, 4  ;;  %s187_s9 = int_to_ptr.vmem [resolvable:$true] %s186_s9 }
  0x12   : > { %p985_p13 = pnand %p719_p11, %p957_p4  ;;  %p777_p1 = scmp.ne.s32.totalorder %s177_s6, %s776_s11 }
  0x13   : > { %p767_p0 = pneg %p979_p12  ;;  %s783_s12 = scalar_lea.vmem %s177_s6, 32 }
  0x14   : > { %s1096_s10 = scalar_select %p985_p13, 1, 0 }
  0x15   : > { %p779_p2 = pnand %p777_p1, %p767_p0  ;;  %p784_p6 = scmp.lt.s32.totalorder %s177_s6, %s177_s6 }
  0x16   : > { %p785_p7 = scmp.lt.s32.totalorder %s783_s12, %s776_s11 }
  0x17   : > { %p780_p3 = pneg %p779_p2 }
  0x18   : > { %p786_p10 = por %p785_p7, %p784_p6 }
  0x1a   : > { %p787_p5 = pnand %p786_p10, %p780_p3 }
  0x1c   : > { %790 = shalt.err (!%p787_p5)
}
  0x1d   : > { %709 = dma.hbm_to_vmem [thread:$0]  (!%p979_p12), %s1084_s2, 16, %s177_s6, [#allocation5]  }
  0x1e   : > { %s802_s15 = scalar_lea.vmem %s187_s9, 6144  ;;  %p810_p2 = scmp.lt.s32.totalorder %s187_s9, %s187_s9 }
  0x1f   : > { %p803_p4 = scmp.ne.s32.totalorder %s187_s9, %s802_s15  ;;  %p811_p8 = scmp.lt.s32.totalorder %s802_s15, %s802_s15 }
  0x21   : > { %p805_p11 = pnand %p803_p4, %p767_p0  ;;  %p812_p9 = por %p811_p8, %p810_p2 }
  0x23   : > { %p806_p1 = pneg %p805_p11 }
  0x25   : > { %p813_p13 = pnand %p812_p9, %p806_p1 }
  0x27   : > { %816 = shalt.err (!%p813_p13)
}
  0x28   : > { %s887_s16 = smov 384   ;;  %s888_s17 = smov 24  }
  0x29   : > { %712 = dma.hbm_to_vmem [thread:$0]  (!%p979_p12), %s1085_s3, 6144, %s187_s9, [#allocation5], %s887_s16, %s887_s16, %s888_s17  }
  0x2a   : > { %s203_s25 = sand.u32 1, %s879_s20   ;;  %s641_s27 = sshll.u32 %s883_s21, 8 }
  0x2b   : > { %s629_s30 = sshll.u32 %s203_s25, 4  ;;  %s1012_s11 = scalar_lea.hbm %s1082_s0, %s641_s27 }
  0x2c   : > { %s207_s12 = scalar_lea.vmem [#allocation2], %s629_s30  ;;  %s1016_s7 = scalar_lea.sflag [#allocation3], %s203_s25 }
  0x2d   : > { %s214_s13 = sshll.u32 %s207_s12, 4  ;;  %s817_s14 = scalar_lea.hbm %s1012_s11, 256  ;;  %s1014_s13 = int_to_ptr.vmem [resolvable:$true] %s214_s13 }
  0x2e   : > { %p818_p5 = scmp.ne.s32.totalorder %s1012_s11, %s817_s14  ;;  %p1097_p8 = scmp.ne.s32.totalorder %s1096_s10, 0 }
  0x2f   : > { %s822_s15 = scalar_lea.hbm %s1082_s0, 512  ;;  %p823_p0 = scmp.lt.s32.totalorder %s1012_s11, %s1082_s0 }
  0x30   : > { %p819_p9 = pneg %p1097_p8  ;;  %p824_p3 = scmp.lt.s32.totalorder %s822_s15, %s817_s14 }
  0x32   : > { %p820_p12 = pnand %p819_p9, %p818_p5  ;;  %p825_p6 = por %p824_p3, %p823_p0 }
  0x34   : > { %p821_p13 = pneg %p820_p12 }
  0x36   : > { %p826_p7 = pnand %p825_p6, %p821_p13 }
  0x38   : > { %829 = shalt.err (!%p826_p7)
}
  0x39   : > { %s830_s18 = scalar_lea.vmem %s1014_s13, 256  ;;  %s889_s24 = smov [#allocation2]  }
  0x3a   : > { %p831_p10 = scmp.ne.s32.totalorder %s1014_s13, %s830_s18  ;;  %s835_s25 = sshll.u32 %s889_s24, 4  ;;  %s836_s25 = int_to_ptr.vmem [resolvable:$false] %s835_s25 }
  0x3b   : > { %s837_s27 = scalar_lea.vmem %s836_s25, 512  ;;  %p838_p1 = scmp.lt.s32.totalorder %s1014_s13, %s836_s25 }
  0x3c   : > { %p833_p4 = pnand %p831_p10, %p819_p9  ;;  %p839_p2 = scmp.lt.s32.totalorder %s837_s27, %s830_s18 }
  0x3e   : > { %p834_p11 = pneg %p833_p4  ;;  %p840_p5 = por %p839_p2, %p838_p1 }
  0x40   : > { %p841_p12 = pnand %p840_p5, %p834_p11 }
  0x42   : > { %844 = shalt.err (!%p841_p12)
}
  0x43   : > { %s890_s30 = smov 128   ;;  %s891_s6 = smov 8  }
  0x44   : > { %716 = dma.hbm_to_vmem [thread:$0]  (!%p1097_p8), %s1012_s11, 256, %s1014_s13, %s1016_s7, %s890_s30, %s890_s30, %s891_s6  }
  0x45   : > { %p1098_p9 = scmp.ne.s32.totalorder %s1094_s29, 0 }
  0x46   : > { %s228_s8 = sand.u32 (!%p1098_p9), 1, %s875_s19   ;;  %p1099_p13 = scmp.ne.s32.totalorder (!%p1098_p9), %s1093_s28, 0 }
  0x47   : > { %226 = sbr.rel (%p1098_p9) target bundleno = 589 (0x24d), region = 40  ;;  %s633_s12 = sshll.u32 (!%p1098_p9), %s228_s8, 4 }
  0x48   : > { %s229_s14 = scalar_lea.sflag (!%p1098_p9), [#allocation3], %s228_s8  ;;  %s232_s21 = scalar_lea.vmem (!%p1098_p9), [#allocation2], %s633_s12 }
  0x4c   : > { %862 = dma.done.wait (%p1099_p13), %s229_s14, 256  }
  0x4d   : > { %864 = vsyncadd (%p1099_p13), %s229_s14, 4294967040  ;;  %p1100_p0 = scmp.eq.s32.totalorder %s942_s22, 0 }
  0x4f   : > { %866 = dma.done.wait (%p1100_p0), [#allocation5], 6160   ;;  %p1101_p3 = pmov %p1100_p0 }
  0x50   : > { %v272_v0 = vld [vmem:[%s232_s21] sm:$0xff]  ;;  %v273_v1 = vld [vmem:[%s232_s21 + $0x8] sm:$0xff]  ;;  %v892_v56 = vmov 0.0   ;;  %p267_p8 = scmp.lt.s32.totalorder %s942_s22, 1 }
  0x51   : > { %868 = vsyncadd (%p1101_p3), [#allocation5], 4294961136  ;;  %276 = vadd.xlane.f32.xlu0 %v272_v0  ;;  %v361_v2 = vld [vmem:[#allocation6 + $0x170] sm:$0xff]  ;;  %v360_v3 = vld [vmem:[#allocation6 + $0x168] sm:$0xff]  ;;  %444 = vmatprep.mubr.f32.mxu0 %v892_v56 }
  0x52   : > { %v358_v4 = vld [vmem:[#allocation6 + $0x158] sm:$0xff]  ;;  %380 = vmatprep.subr.mxu0 %v361_v2  ;;  %v357_v5 = vld [vmem:[#allocation6 + $0x150] sm:$0xff]  ;;  %v355_v7 = vld [vmem:[#allocation6 + $0x140] sm:$0xff]  ;;  %s1107_s22 = smov (!%p267_p8, %s942_s22), 1 }
  0x53   : > { %v362_v6 = vld [vmem:[#allocation6 + $0x178] sm:$0xff]  ;;  %381 = vmatpush1.msra.mxu0 %v360_v3  ;;  %v359_v8 = vld [vmem:[#allocation6 + $0x160] sm:$0xff]  ;;  %v352_v10 = vld [vmem:[#allocation6 + $0x128] sm:$0xff]  ;;  %s695_s13 = smul.u32 48, %s1107_s22 }
  0x54   : > { %660 = vmatprep.subr.mxu1 %v362_v6  ;;  %382 = vmatprep.subr.mxu0 %v358_v4  ;;  %v354_v9 = vld [vmem:[#allocation6 + $0x138] sm:$0xff]  ;;  %v351_v11 = vld [vmem:[#allocation6 + $0x120] sm:$0xff]  ;;  %v349_v20 = vld [vmem:[#allocation6 + $0x110] sm:$0xff] }
  0x55   : > { %278 = vadd.xlane.f32.xlu0 %v273_v1  ;;  %661 = vmatpush3.msra.mxu1 %v362_v6  ;;  %v356_v21 = vld [vmem:[#allocation6 + $0x148] sm:$0xff]  ;;  %v346_v23 = vld [vmem:[#allocation6 + $0xf8] sm:$0xff]  ;;  %v353_v24 = vld [vmem:[#allocation6 + $0x130] sm:$0xff]  ;;  %s271_s15 = scalar_lea.vmem %s1087_s5, %s695_s13 }
  0x56   : > { %383 = vmatpush1.msra.mxu0 %v357_v5  ;;  %662 = vmatprep.subr.mxu1 %v359_v8  ;;  %v348_v22 = vld [vmem:[#allocation6 + $0x108] sm:$0xff]  ;;  %v345_v25 = vld [vmem:[#allocation6 + $0xf0] sm:$0xff]  ;;  %v343_v26 = vld [vmem:[#allocation6 + $0xe0] sm:$0xff] }
  0x57   : > { %384 = vmatprep.subr.mxu0 %v355_v7  ;;  %663 = vmatpush3.msra.mxu1 %v359_v8  ;;  %v350_v27 = vld [vmem:[#allocation6 + $0x118] sm:$0xff]  ;;  %v340_v29 = vld [vmem:[#allocation6 + $0xc8] sm:$0xff]  ;;  %v347_v30 = vld [vmem:[#allocation6 + $0x100] sm:$0xff] }
  0x58   : > { %385 = vmatpush1.msra.mxu0 %v354_v9  ;;  %664 = vmatprep.subr.mxu1 %v356_v21  ;;  %v342_v28 = vld [vmem:[#allocation6 + $0xd8] sm:$0xff]  ;;  %v339_v31 = vld [vmem:[#allocation6 + $0xc0] sm:$0xff]  ;;  %v337_v32 = vld [vmem:[#allocation6 + $0xb0] sm:$0xff] }
  0x59   : > { %386 = vmatprep.subr.mxu0 %v352_v10  ;;  %665 = vmatpush3.msra.mxu1 %v356_v21  ;;  %v344_v33 = vld [vmem:[#allocation6 + $0xe8] sm:$0xff]  ;;  %v334_v35 = vld [vmem:[#allocation6 + $0x98] sm:$0xff]  ;;  %v341_v36 = vld [vmem:[#allocation6 + $0xd0] sm:$0xff] }
  0x5a   : > { %387 = vmatpush1.msra.mxu0 %v351_v11  ;;  %666 = vmatprep.subr.mxu1 %v353_v24  ;;  %v336_v34 = vld [vmem:[#allocation6 + $0xa8] sm:$0xff]  ;;  %v333_v37 = vld [vmem:[#allocation6 + $0x90] sm:$0xff]  ;;  %v331_v38 = vld [vmem:[#allocation6 + $0x80] sm:$0xff]  ;;  %v365_v11 = vlaneseq }
  0x5b   : > { %388 = vmatprep.subr.mxu0 %v349_v20  ;;  %667 = vmatpush3.msra.mxu1 %v353_v24  ;;  %v338_v39 = vld [vmem:[#allocation6 + $0xb8] sm:$0xff]  ;;  %v328_v41 = vld [vmem:[#allocation6 + $0x68] sm:$0xff]  ;;  %v335_v42 = vld [vmem:[#allocation6 + $0xa0] sm:$0xff] }
  0x5c   : > { %389 = vmatpush1.msra.mxu0 %v348_v22  ;;  %668 = vmatprep.subr.mxu1 %v350_v27  ;;  %v330_v40 = vld [vmem:[#allocation6 + $0x78] sm:$0xff]  ;;  %v327_v43 = vld [vmem:[#allocation6 + $0x60] sm:$0xff]  ;;  %v325_v44 = vld [vmem:[#allocation6 + $0x50] sm:$0xff] }
  0x5d   : > { %390 = vmatprep.subr.mxu0 %v346_v23  ;;  %669 = vmatpush3.msra.mxu1 %v350_v27  ;;  %v332_v45 = vld [vmem:[#allocation6 + $0x88] sm:$0xff]  ;;  %v322_v47 = vld [vmem:[#allocation6 + $0x38] sm:$0xff]  ;;  %v329_v48 = vld [vmem:[#allocation6 + $0x70] sm:$0xff] }
  0x5e   : > { %391 = vmatpush1.msra.mxu0 %v345_v25  ;;  %670 = vmatprep.subr.mxu1 %v347_v30  ;;  %v324_v46 = vld [vmem:[#allocation6 + $0x48] sm:$0xff]  ;;  %v321_v49 = vld [vmem:[#allocation6 + $0x30] sm:$0xff]  ;;  %v319_v50 = vld [vmem:[#allocation6 + $0x20] sm:$0xff] }
  0x5f   : > { %392 = vmatprep.subr.mxu0 %v343_v26  ;;  %671 = vmatpush3.msra.mxu1 %v347_v30  ;;  %v326_v51 = vld [vmem:[#allocation6 + $0x58] sm:$0xff]  ;;  %v316_v53 = vld [vmem:[#allocation6 + $0x8] sm:$0xff]  ;;  %v323_v54 = vld [vmem:[#allocation6 + $0x40] sm:$0xff] }
  0x60   : > { %393 = vmatpush1.msra.mxu0 %v342_v28  ;;  %672 = vmatprep.subr.mxu1 %v344_v33  ;;  %v318_v52 = vld [vmem:[#allocation6 + $0x18] sm:$0xff]  ;;  %v315_v55 = vld [vmem:[#allocation6] sm:$0xff]  ;;  %v320_v57 = vld [vmem:[#allocation6 + $0x28] sm:$0xff] }
  0x61   : > { %394 = vmatprep.subr.mxu0 %v340_v29  ;;  %673 = vmatpush3.msra.mxu1 %v344_v33  ;;  %v317_v58 = vld [vmem:[#allocation6 + $0x10] sm:$0xff]  ;;  %v637_v2 = vld [vmem:[%s1083_s1] ss:$0 sm:$0xff] }
  0x62   : > { %395 = vmatpush1.msra.mxu0 %v339_v31  ;;  %674 = vmatprep.subr.mxu1 %v341_v36  ;;  %v638_v4 = vld [vmem:[#allocation4] ss:$0 sm:$0xff] }
  0x63   : > { %396 = vmatprep.subr.mxu0 %v337_v32  ;;  %675 = vmatpush3.msra.mxu1 %v341_v36 }
  0x64   : > { %397 = vmatpush1.msra.mxu0 %v336_v34  ;;  %676 = vmatprep.subr.mxu1 %v338_v39 }
  0x65   : > { %398 = vmatprep.subr.mxu0 %v334_v35  ;;  %677 = vmatpush3.msra.mxu1 %v338_v39 }
  0x66   : > { %399 = vmatpush1.msra.mxu0 %v333_v37  ;;  %678 = vmatprep.subr.mxu1 %v335_v42 }
  0x67   : > { %400 = vmatprep.subr.mxu0 %v331_v38  ;;  %679 = vmatpush3.msra.mxu1 %v335_v42 }
  0x68   : > { %401 = vmatpush1.msra.mxu0 %v330_v40  ;;  %680 = vmatprep.subr.mxu1 %v332_v45 }
  0x69   : > { %402 = vmatprep.subr.mxu0 %v328_v41  ;;  %681 = vmatpush3.msra.mxu1 %v332_v45 }
  0x6a   : > { %403 = vmatpush1.msra.mxu0 %v327_v43  ;;  %682 = vmatprep.subr.mxu1 %v329_v48 }
  0x6b   : > { %404 = vmatprep.subr.mxu0 %v325_v44  ;;  %683 = vmatpush3.msra.mxu1 %v329_v48 }
  0x6c   : > { %405 = vmatpush1.msra.mxu0 %v324_v46  ;;  %684 = vmatprep.subr.mxu1 %v326_v51 }
  0x6d   : > { %406 = vmatprep.subr.mxu0 %v322_v47  ;;  %685 = vmatpush3.msra.mxu1 %v326_v51 }
  0x6e   : > { %407 = vmatpush1.msra.mxu0 %v321_v49  ;;  %686 = vmatprep.subr.mxu1 %v323_v54 }
  0x6f   : > { %408 = vmatprep.subr.mxu0 %v319_v50  ;;  %687 = vmatpush3.msra.mxu1 %v323_v54 }
  0x70   : > { %409 = vmatpush1.msra.mxu0 %v318_v52  ;;  %688 = vmatprep.subr.mxu1 %v320_v57 }
  0x71   : > { %410 = vmatprep.subr.mxu0 %v316_v53  ;;  %689 = vmatpush3.msra.mxu1 %v320_v57 }
  0x72   : > { %411 = vmatpush1.msra.mxu0 %v315_v55  ;;  %690 = vmatprep.subr.mxu1 %v317_v58 }
  0x73   : > { %691 = vmatpush3.msra.mxu1 %v317_v58 }
  0xda   : > { %v277_v12 = vpop.xlane.xlu0 %276 }
  0xdb   : > { %v281_v13 = vmul.f32 0.0078125, %v277_v12  ;;  %v366_v12 = vshrl.u32 %v365_v11, 7 }
  0xdd   : > { %v1048_v14 = vsub.f32 %v272_v0, %v281_v13  ;;  %v367_v13 = vsub.s32 0, %v366_v12 }
  0xde   : > { %v279_v15 = vpop.xlane.xlu0 %278 }
  0xdf   : > { %v282_v16 = vmul.f32 0.0078125, %v279_v15  ;;  %v285_v17 = vmul.f32 %v1048_v14, %v1048_v14  ;;  %v371_v15 = vsub.s32 1, %v366_v12 }
  0xe1   : > { %v1052_v18 = vsub.f32 %v273_v1, %v282_v16  ;;  %287 = vadd.xlane.f32.xlu1 %v285_v17  ;;  %v375_v17 = vsub.s32 2, %v366_v12 }
  0xe3   : > { %v286_v19 = vmul.f32 %v1052_v18, %v1052_v18 }
  0xe5   : > { %289 = vadd.xlane.f32.xlu1 %v286_v19 }
 0x16a   : > { %v288_v59 = vpop.xlane.xlu1 %287 }
 0x16b   : > { %v291_v60 = vmul.f32 0.0078125, %v288_v59 }
 0x16d   : > { %v293_v61 = vadd.f32 1e-06, %v291_v60 }
 0x16e   : > { %v290_v62 = vpop.xlane.xlu1 %289 }
 0x16f   : > { %761 = vrsqrt.f32 %v293_v61  ;;  %v292_v63 = vmul.f32 0.0078125, %v290_v62 }
 0x171   : > { %v294_v0 = vadd.f32 1e-06, %v292_v63 }
 0x173   : > { %763 = vrsqrt.f32 %v294_v0 }
 0x17c   : > { %v762_v1 = vpop.eup %761 }
 0x17d   : > { %v297_v3 = vmul.f32 %v762_v1, %v1048_v14  ;;  %v363_v14 = vld [vmem:[%s1086_s4] sm:$0x7] }
 0x17e   : > { %v368_v16 = vrot.slane %v363_v14, %v367_v13  ;;  %v376_v21 = vrot.slane %v363_v14, %v375_v17 }
 0x17f   : > { %v305_v5 = vmul.f32 %v637_v2, %v297_v3 }
 0x180   : > { %v764_v6 = vpop.eup %763 }
 0x181   : > { %v313_v7 = vadd.f32 %v638_v4, %v305_v5  ;;  %v298_v8 = vmul.f32 %v764_v6, %v1052_v18  ;;  %v372_v18 = vrot.slane %v363_v14, %v371_v15 }
 0x183   : > { %445 = vmatmul.mubr.f32.vlgmr.msra.gmra.mxu0 %v313_v7  ;;  %692 = vmatprep.mubr.f32.mxu1 %v313_v7  ;;  %v306_v9 = vmul.f32 %v637_v2, %v298_v8 }
 0x184   : > { %450 = vmatprep.mubr.f32.mxu0 %v892_v56 }
 0x185   : > { %v314_v10 = vadd.f32 %v638_v4, %v306_v9 }
 0x187   : > { %451 = vmatmul.mubr.f32.gmra.mxu0 %v314_v10  ;;  %693 = vmatmul.mubr.f32.vlgmr.msra.gmra.mxu1 %v314_v10 }
 0x243   : > { %v446_v19 = vpop.f32.mrf.mxu0 }
 0x244   : > { %v447_v20 = vadd.f32 %v446_v19, %v368_v16 }
 0x245   : > { %v448_v22 = vpop.f32.mrf.mxu0 }
 0x246   : > { %532 = vst [vmem:[%s271_s15] sm:$0xff] %v447_v20  ;;  %v449_v23 = vadd.f32 %v448_v22, %v372_v18 }
 0x247   : > { %v452_v24 = vpop.f32.mrf.mxu0  ;;  %v694_v25 = vpop.f32.mrf.mxu1 }
 0x248   : > { %533 = vst [vmem:[%s271_s15 + $0x8] sm:$0xff] %v449_v23  ;;  %v453_v26 = vadd.f32 %v452_v24, %v368_v16  ;;  %v529_v27 = vadd.f32 %v694_v25, %v376_v21 }
 0x249   : > { %v454_v28 = vpop.f32.mrf.mxu0  ;;  %v523_v29 = vpop.f32.mrf.mxu1 }
 0x24a   : > { %535 = vst [vmem:[%s271_s15 + $0x18] sm:$0xff] %v453_v26  ;;  %537 = vst [vmem:[%s271_s15 + $0x28] sm:$0xff] %v529_v27  ;;  %v455_v30 = vadd.f32 %v454_v28, %v372_v18  ;;  %v524_v31 = vadd.f32 %v523_v29, %v376_v21 }
 0x24c   : > { %536 = vst [vmem:[%s271_s15 + $0x20] sm:$0xff] %v455_v30  ;;  %534 = vst [vmem:[%s271_s15 + $0x10] sm:$0xff] %v524_v31 }
 0x24d PF: > { %p16_p6 = scmp.ge.s32.totalorder %s945_s23, 4   ;;  %s1102_s18 = smov %s875_s19 }
 0x24e   : > { %s1103_s19 = smov %s879_s20  ;;  %s1104_s20 = smov %s955_s26 }
 0x24f   : > { %s1105_s21 = smov %s945_s23  ;;  %18 = sbr.rel (!%p16_p6) target bundleno = 4 (0x4), region = 88 }
 0x254   :  { %559 = vsyncpa [#allocation3], 1 }
 0x255   :  { %561 = vsyncpa [#allocation3 + $0x1], 1 }
 0x256   :  { %562 = vsyncpa [#allocation5], 1 }

// kernel: block_forward.3
= control target key start
LH: loop header
LB: loop body
LE: loop exit
PB: predicated region body
PF: predicated region fallthrough
CT: control target
= control target key end

     0   :  { %s3411_s0 = inlined_call_operand.vmem [shape: f32[2,16,128], index: 0, kind: input, shape index: {}]   ;;  %s3412_s1 = inlined_call_operand.vmem [shape: f32[2,4,16,32], index: 1, kind: input, shape index: {}]   ;;  %s3413_s2 = inlined_call_operand.vmem [shape: f32[2,4,16,32], index: 2, kind: input, shape index: {}]   ;;  %s3414_s3 = inlined_call_operand.vmem [shape: f32[2,4,16,32], index: 3, kind: input, shape index: {}]   ;;  %s3415_s4 = inlined_call_operand.vmem [shape: f32[4,32,128], index: 4, kind: input, shape index: {}]   ;;  %s3416_s5 = inlined_call_operand.vmem [shape: f32[1,128], index: 5, kind: input, shape index: {}]   ;;  %s3417_s6 = inlined_call_operand.vmem [shape: f32[1,128], index: 6, kind: input, shape index: {}]   ;;  %s3418_s7 = inlined_call_operand.vmem [shape: f32[1,128], index: 7, kind: input, shape index: {}]   ;;  %s3419_s8 = inlined_call_operand.vmem [shape: f32[128,384], index: 8, kind: input, shape index: {}]   ;;  %s3420_s9 = inlined_call_operand.vmem [shape: f32[1,384], index: 9, kind: input, shape index: {}]   ;;  %s3421_s10 = inlined_call_operand.vmem [shape: f32[384,128], index: 10, kind: input, shape index: {}]   ;;  %s3422_s11 = inlined_call_operand.vmem [shape: f32[1,128], index: 11, kind: input, shape index: {}]   ;;  %s3423_s12 = inlined_call_operand.hbm [shape: f32[2,16,128], index: 12, kind: output, shape index: {}]  }
   0x1   :  { %3424 = sst [smem:[#allocation5_spill]] %s3411_s0 }
   0x2   :  { %3425 = sst [smem:[#allocation6_spill]] %s3412_s1 }
   0x3   :  { %17 = vsyncpa [#allocation3], 0 }
   0x4   :  { %19 = vsyncpa [#allocation3 + $0x1], 0  ;;  %s2814_s21 = smov 0   ;;  %s2816_s22 = smov 0  }
   0x5   :  { %s2818_s23 = smov 0   ;;  %s2820_s24 = smov 0  }
   0x6 LB: > { %s2835_s25 = sadd.s32 4294967295, %s2743_s24   ;;  %s2234_s26 = sadd.s32 4294967294, %s2743_s24   ;;  %s2743_s24 = sphi %s2820_s24, %s3433_s24   ;;  %s2739_s23 = sphi %s2818_s23, %s3432_s23   ;;  %s2735_s22 = sphi %s2816_s22, %s3431_s22   ;;  %s2731_s21 = sphi %s2814_s21, %s3430_s21  }
   0x7   : > { %s2839_s27 = sadd.s32 1, %s2743_s24   ;;  %s304_s28 = sadd.s32 1, %s2739_s23 }
   0x8   : > { %s301_s29 = ssub.s32 %s2743_s24, %s2839_s27  ;;  %p314_p0 = scmp.ne.s32.totalorder %s2739_s23, %s2735_s22 }
   0x9   : > { %p302_p1 = scmp.eq.s32.totalorder %s301_s29, 0  ;;  %p315_p2 = scmp.eq.s32.totalorder %s2835_s25, 1 }
   0xa   : > { %p320_p3 = scmp.ne.s32.totalorder %s2735_s22, %s2731_s21  ;;  %p321_p4 = scmp.eq.s32.totalorder %s2234_s26, 1 }
   0xb   : > { %s2850_s30 = scalar_select %p302_p1, %s2739_s23, %s304_s28  }
   0xc   : > { %p2852_p5 = por %p315_p2, %p314_p0  ;;  %p2856_p6 = por %p321_p4, %p320_p3 }
   0xd   : > { %p2237_p7 = scmp.ge.s32.totalorder %s2743_s24, 1  ;;  %p395_p8 = scmp.lt.s32.totalorder %s2743_s24, 3 }
   0xf   : > { %p396_p9 = pnand %p2237_p7, %p395_p8 }
  0x10   : > { %p452_p10 = scmp.lt.s32.totalorder (!%p396_p9), %s2835_s25, 1  ;;  %s3428_s1 = sld [smem:[#allocation6_spill]] (!%p396_p9) }
  0x11   : > { %399 = sbr.rel (%p396_p9) target bundleno = 1701 (0x6a5), region = 68  ;;  %s3429_s0 = sld [smem:[#allocation5_spill]] (!%p396_p9) }
  0x16   : > { %s2864_s15 = scalar_select %p452_p10, %s2835_s25, 1  ;;  %vm496_vm0 = vcmask 261120   ;;  %vm845_vm1 = vcmask 130048  }
  0x18   : > { %s2867_s16 = sshll.u32 %s2864_s15, 6 }
  0x19   : > { %s2873_s19 = scalar_lea.vmem %s3413_s2, %s2867_s16  ;;  %s2879_s28 = scalar_lea.vmem %s3428_s1, %s2867_s16 }
  0x1a   : > { %v489_v0 = vld [vmem:[%s2873_s19 + $0x8] sm:$0xff]  ;;  %v491_v1 = vld [vmem:[%s2873_s19 + $0x18] sm:$0xff]  ;;  %v488_v2 = vld [vmem:[%s2873_s19] sm:$0xff]  ;;  %s2956_s18 = scalar_lea.vmem %s3414_s3, %s2867_s16  ;;  %s2288_s16 = sshll.u32 %s2864_s15, 4 }
  0x1b   : > { %2423 = vmatprep.subr.msk.mxu0 %vm496_vm0, %v489_v0  ;;  %2430 = vmatprep.subr.msk.mxu1 %vm496_vm0, %v491_v1  ;;  %v490_v3 = vld [vmem:[%s2873_s19 + $0x10] sm:$0xff]  ;;  %v472_v4 = vld [vmem:[%s2879_s28] sm:$0xff]  ;;  %v473_v8 = vld [vmem:[%s2879_s28 + $0x8] sm:$0xff]  ;;  %s456_s26 = scalar_lea.vmem %s3429_s0, %s2288_s16  ;;  %s449_s0 = sand.u32 1, %s2735_s22  }
  0x1c   : > { %v474_v5 = vld [vmem:[%s2879_s28 + $0x10] sm:$0xff]  ;;  %2424 = vmatpush3.xpose.msk.msra.mxu0 %vm496_vm0, %v489_v0  ;;  %2431 = vmatpush3.xpose.msk.msra.mxu1 %vm496_vm0, %v491_v1  ;;  %v480_v6 = vmul.f32 0.17677669, %v472_v4  ;;  %v475_v9 = vld [vmem:[%s2879_s28 + $0x18] sm:$0xff]  ;;  %v493_v10 = vld [vmem:[%s2873_s19 + $0x28] sm:$0xff]  ;;  %s2238_s17 = sshll.u32 %s449_s0, 4 }
  0x1d   : > { %v482_v7 = vmul.f32 0.17677669, %v474_v5  ;;  %2425 = vmatprep.subr.msk.mxu0 %vm496_vm0, %v488_v2  ;;  %2432 = vmatprep.subr.msk.mxu1 %vm496_vm0, %v490_v3  ;;  %v495_v11 = vld [vmem:[%s2873_s19 + $0x38] sm:$0xff]  ;;  %v476_v12 = vld [vmem:[%s2879_s28 + $0x20] sm:$0xff]  ;;  %v481_v13 = vmul.f32 0.17677669, %v473_v8 }
  0x1e   : > { %2427 = vmatprep.mubr.msk.f32.mxu0 %vm496_vm0, %v480_v6  ;;  %v483_v14 = vmul.f32 0.17677669, %v475_v9  ;;  %v478_v15 = vld [vmem:[%s2879_s28 + $0x30] sm:$0xff]  ;;  %v484_v16 = vmul.f32 0.17677669, %v476_v12  ;;  %v492_v17 = vld [vmem:[%s2873_s19 + $0x20] sm:$0xff] }
  0x1f   : > { %2434 = vmatprep.mubr.msk.f32.mxu1 %vm496_vm0, %v482_v7  ;;  %v486_v18 = vmul.f32 0.17677669, %v478_v15  ;;  %v494_v19 = vld [vmem:[%s2873_s19 + $0x30] sm:$0xff]  ;;  %v477_v20 = vld [vmem:[%s2879_s28 + $0x28] sm:$0xff]  ;;  %v479_v21 = vld [vmem:[%s2879_s28 + $0x38] sm:$0xff]  ;;  %s2292_s19 = sshll.u32 %s2835_s25, 8 }
  0x20   : > { %2426 = vmatpush3.xpose.msk.msra.mxu0 %vm496_vm0, %v488_v2  ;;  %2433 = vmatpush3.xpose.msk.msra.mxu1 %vm496_vm0, %v490_v3  ;;  %v485_v22 = vmul.f32 0.17677669, %v477_v20  ;;  %v487_v23 = vmul.f32 0.17677669, %v479_v21  ;;  %v939_v20 = vld [vmem:[%s2956_s18 + $0x28] sm:$0xff]  ;;  %v941_v21 = vld [vmem:[%s2956_s18 + $0x38] sm:$0xff]  ;;  %s3368_s28 = scalar_lea.hbm %s3423_s12, %s2292_s19 }
  0x21   : > { %2437 = vmatprep.subr.msk.mxu0 %vm496_vm0, %v493_v10  ;;  %2444 = vmatprep.subr.msk.mxu1 %vm496_vm0, %v495_v11  ;;  %s3371_s29 = scalar_lea.sflag [#allocation3], %s449_s0  ;;  %s2746_s25 = smov [#allocation2]  }
  0x23   : > { %2428 = vmatmul.mubr.msk.f32.vlgmr.msra.gmra.mxu0 %vm496_vm0, %v481_v13  ;;  %2435 = vmatmul.mubr.msk.f32.vlgmr.msra.gmra.mxu1 %vm496_vm0, %v483_v14 }
  0x24   : > { %2438 = vmatpush3.xpose.msk.msra.mxu0 %vm496_vm0, %v493_v10  ;;  %2445 = vmatpush3.xpose.msk.msra.mxu1 %vm496_vm0, %v495_v11 }
  0x25   : > { %2439 = vmatprep.subr.msk.mxu0 %vm496_vm0, %v492_v17  ;;  %2441 = vmatprep.mubr.msk.f32.mxu0 %vm496_vm0, %v484_v16  ;;  %v935_v16 = vld [vmem:[%s2956_s18 + $0x8] sm:$0xff] }
  0x26   : > { %2446 = vmatprep.subr.msk.mxu1 %vm496_vm0, %v494_v19  ;;  %2448 = vmatprep.mubr.msk.f32.mxu1 %vm496_vm0, %v486_v18  ;;  %v937_v18 = vld [vmem:[%s2956_s18 + $0x18] sm:$0xff] }
  0x28   : > { %2440 = vmatpush3.xpose.msk.msra.mxu0 %vm496_vm0, %v492_v17  ;;  %2447 = vmatpush3.xpose.msk.msra.mxu1 %vm496_vm0, %v494_v19  ;;  %v934_v17 = vld [vmem:[%s2956_s18] sm:$0xff]  ;;  %v936_v19 = vld [vmem:[%s2956_s18 + $0x10] sm:$0xff] }
  0x29   : > { %2451 = vmatprep.subr.mxu0 %v935_v16  ;;  %2458 = vmatprep.subr.mxu1 %v937_v18 }
  0x2b   : > { %2442 = vmatmul.mubr.msk.f32.vlgmr.msra.gmra.mxu0 %vm496_vm0, %v485_v22  ;;  %2449 = vmatmul.mubr.msk.f32.vlgmr.msra.gmra.mxu1 %vm496_vm0, %v487_v23 }
  0x2c   : > { %2452 = vmatpush3.msra.mxu0 %v935_v16  ;;  %2459 = vmatpush3.msra.mxu1 %v937_v18  ;;  %v2279_v18 = vld [vmem:[%s3416_s5] ss:$0 sm:$0xff] }
  0x2d   : > { %2453 = vmatprep.subr.mxu0 %v934_v17  ;;  %2460 = vmatprep.subr.mxu1 %v936_v19 }
  0x2e   : > { %2454 = vmatpush3.msra.mxu0 %v934_v17  ;;  %2461 = vmatpush3.msra.mxu1 %v936_v19 }
  0x2f   : > { %2465 = vmatprep.subr.mxu0 %v939_v20  ;;  %2472 = vmatprep.subr.mxu1 %v941_v21 }
  0xe3   : > { %v2429_v24 = vpop.f32.mrf.mxu0  ;;  %v2436_v25 = vpop.f32.mrf.mxu1 }
  0xe4   : > { %v855_v26 = vsel %vm845_vm1, %v2436_v25, -inf  ;;  %v849_v31 = vsel %vm845_vm1, %v2429_v24, -inf }
  0xe5   : > { %856 = vmax.xlane.f32.xlu1 %v855_v26  ;;  %v575_v27 = vpop.f32.mrf.mxu0  ;;  %v662_v28 = vpop.f32.mrf.mxu1 }
  0xe6   : > { %v846_v29 = vsel %vm845_vm1, %v575_v27, -inf  ;;  %v852_v30 = vsel %vm845_vm1, %v662_v28, -inf }
  0xe7   : > { %847 = vmax.xlane.f32.xlu0 %v846_v29 }
  0xe9   : > { %853 = vmax.xlane.f32.xlu1 %v852_v30 }
  0xeb   : > { %850 = vmax.xlane.f32.xlu0 %v849_v31  ;;  %v2443_v32 = vpop.f32.mrf.mxu0  ;;  %v2450_v33 = vpop.f32.mrf.mxu1 }
  0xec   : > { %v861_v34 = vsel %vm845_vm1, %v2443_v32, -inf  ;;  %v867_v38 = vsel %vm845_vm1, %v2450_v33, -inf }
  0xed   : > { %862 = vmax.xlane.f32.xlu1 %v861_v34  ;;  %v749_v35 = vpop.f32.mrf.mxu0  ;;  %v836_v36 = vpop.f32.mrf.mxu1 }
  0xee   : > { %v858_v37 = vsel %vm845_vm1, %v749_v35, -inf  ;;  %v864_v39 = vsel %vm845_vm1, %v836_v36, -inf }
  0xef   : > { %859 = vmax.xlane.f32.xlu0 %v858_v37 }
  0xf1   : > { %868 = vmax.xlane.f32.xlu1 %v867_v38  ;;  %v1269_v38 = vld [vmem:[%s3415_s4 + $0x18] sm:$0xff] }
  0xf3   : > { %865 = vmax.xlane.f32.xlu0 %v864_v39 }
 0x16e   : > { %v857_v40 = vpop.xlane.xlu1 %856 }
 0x16f   : > { %v873_v44 = vsub.f32 %v2436_v25, %v857_v40 }
 0x170   : > { %v848_v41 = vpop.xlane.xlu0 %847 }
 0x171   : > { %v870_v42 = vsub.f32 %v575_v27, %v848_v41  ;;  %v884_v51 = vmul.f32 1.442695, %v873_v44 }
 0x172   : > { %v854_v43 = vpop.xlane.xlu1 %853 }
 0x173   : > { %v878_v45 = vmul.f32 1.442695, %v870_v42  ;;  %v872_v46 = vsub.f32 %v662_v28, %v854_v43  ;;  %v940_v42 = vld [vmem:[%s2956_s18 + $0x30] sm:$0xff] }
 0x174   : > { %v851_v47 = vpop.xlane.xlu0 %850 }
 0x175   : > { %2635 = vpow2.f32 %v878_v45  ;;  %v882_v48 = vmul.f32 1.442695, %v872_v46  ;;  %v871_v49 = vsub.f32 %v2429_v24, %v851_v47  ;;  %v1268_v47 = vld [vmem:[%s3415_s4 + $0x10] sm:$0xff] }
 0x176   : > { %v863_v50 = vpop.xlane.xlu1 %862 }
 0x177   : > { %2637 = vpow2.f32 %v882_v48  ;;  %v880_v52 = vmul.f32 1.442695, %v871_v49  ;;  %v875_v53 = vsub.f32 %v2443_v32, %v863_v50  ;;  %v1267_v50 = vld [vmem:[%s3415_s4 + $0x8] sm:$0xff] }
 0x178   : > { %v860_v54 = vpop.xlane.xlu0 %859 }
 0x179   : > { %2639 = vpow2.f32 %v880_v52  ;;  %v874_v55 = vsub.f32 %v749_v35, %v860_v54  ;;  %v888_v57 = vmul.f32 1.442695, %v875_v53  ;;  %v1266_v52 = vld [vmem:[%s3415_s4] sm:$0xff]  ;;  %v1272_v53 = vld [vmem:[%s3415_s4 + $0x30] sm:$0xff]  ;;  %v1271_v54 = vld [vmem:[%s3415_s4 + $0x28] sm:$0xff] }
 0x17a   : > { %v869_v56 = vpop.xlane.xlu1 %868  ;;  %2641 = vpow2.f32 %v884_v51  ;;  %v1273_v51 = vld [vmem:[%s3415_s4 + $0x38] sm:$0xff] }
 0x17b   : > { %v886_v58 = vmul.f32 1.442695, %v874_v55  ;;  %v877_v59 = vsub.f32 %v2450_v33, %v869_v56  ;;  %v1277_v55 = vld [vmem:[%s3415_s4 + $0x58] sm:$0xff]  ;;  %v1270_v56 = vld [vmem:[%s3415_s4 + $0x20] sm:$0xff] }
 0x17c   : > { %v866_v60 = vpop.xlane.xlu0 %865 }
 0x17d   : > { %2643 = vpow2.f32 %v886_v58  ;;  %v876_v61 = vsub.f32 %v836_v36, %v866_v60  ;;  %v892_v62 = vmul.f32 1.442695, %v877_v59  ;;  %v938_v36 = vld [vmem:[%s2956_s18 + $0x20] sm:$0xff]  ;;  %v1276_v60 = vld [vmem:[%s3415_s4 + $0x50] sm:$0xff]  ;;  %s451_s18 = scalar_lea.vmem [#allocation2], %s2238_s17  ;;  %s2687_s17 = sshll.u32 %s2746_s25, 4  ;;  %s2688_s17 = int_to_ptr.vmem [resolvable:$false] %s2687_s17 }
 0x17e   : > { %2645 = vpow2.f32 %v888_v57  ;;  %v1281_v57 = vld [vmem:[%s3415_s4 + $0x78] sm:$0xff]  ;;  %s2136_s16 = sshll.u32 %s451_s18, 4  ;;  %s2689_s1 = scalar_lea.vmem %s2688_s17, 512  ;;  %s3363_s16 = int_to_ptr.vmem [resolvable:$true] %s2136_s16 }
 0x17f   : > { %v890_v63 = vmul.f32 1.442695, %v876_v61  ;;  %s2683_s15 = scalar_lea.vmem %s3363_s16, 256  ;;  %p2690_p0 = scmp.lt.s32.totalorder %s3363_s16, %s2688_s17 }
 0x180   : > { %p2684_p11 = scmp.ne.s32.totalorder %s3363_s16, %s2683_s15  ;;  %p2691_p1 = scmp.lt.s32.totalorder %s2689_s1, %s2683_s15 }
 0x181   : > { %2647 = vpow2.f32 %v890_v63 }
 0x182   : > { %v2636_v0 = vpop.eup %2635  ;;  %2649 = vpow2.f32 %v892_v62  ;;  %v1275_v62 = vld [vmem:[%s3415_s4 + $0x48] sm:$0xff]  ;;  %p2685_p12 = pnand %p2684_p11, %p2852_p5  ;;  %p2692_p2 = por %p2691_p1, %p2690_p0 }
 0x183   : > { %v894_v1 = vsel %vm845_vm1, %v2636_v0, 0.0 }
 0x184   : > { %v2638_v2 = vpop.eup %2637  ;;  %895 = vadd.xlane.f32.xlu0 %v894_v1  ;;  %v1280_v1 = vld [vmem:[%s3415_s4 + $0x70] sm:$0xff]  ;;  %p2686_p13 = pneg %p2685_p12 }
 0x185   : > { %v900_v5 = vsel %vm845_vm1, %v2638_v2, 0.0 }
 0x186   : > { %v2640_v3 = vpop.eup %2639  ;;  %p2693_p3 = pnand %p2692_p2, %p2686_p13 }
 0x187   : > { %v897_v4 = vsel %vm845_vm1, %v2640_v3, 0.0  ;;  %v2932_v6 = vpop.eup %2641 }
 0x188   : > { %898 = vadd.xlane.f32.xlu1 %v897_v4  ;;  %901 = vadd.xlane.f32.xlu0 %v900_v5  ;;  %v903_v8 = vsel %vm845_vm1, %v2932_v6, 0.0  ;;  %v1279_v4 = vld [vmem:[%s3415_s4 + $0x68] sm:$0xff] }
 0x18a   : > { %v2934_v7 = vpop.eup %2643 }
 0x18b   : > { %v906_v9 = vsel %vm845_vm1, %v2934_v7, 0.0  ;;  %v2940_v10 = vpop.eup %2645 }
 0x18c   : > { %904 = vadd.xlane.f32.xlu1 %v903_v8  ;;  %907 = vadd.xlane.f32.xlu0 %v906_v9  ;;  %v909_v12 = vsel %vm845_vm1, %v2940_v10, 0.0 }
 0x18e   : > { %v2942_v11 = vpop.eup %2647 }
 0x18f   : > { %v912_v13 = vsel %vm845_vm1, %v2942_v11, 0.0  ;;  %v2948_v14 = vpop.eup %2649 }
 0x190   : > { %910 = vadd.xlane.f32.xlu1 %v909_v12  ;;  %913 = vadd.xlane.f32.xlu0 %v912_v13  ;;  %v915_v15 = vsel %vm845_vm1, %v2948_v14, 0.0 }
 0x194   : > { %916 = vadd.xlane.f32.xlu1 %v915_v15 }
 0x20d   : > { %v896_v22 = vpop.xlane.xlu0 %895 }
 0x20e   : > { %2651 = vrcp.f32 %v896_v22  ;;  %v1622_v22 = vld [vmem:[%s456_s26 + $0x8] sm:$0xff] }
 0x211   : > { %v899_v23 = vpop.xlane.xlu1 %898  ;;  %v902_v24 = vpop.xlane.xlu0 %901 }
 0x212   : > { %2653 = vrcp.f32 %v899_v23 }
 0x213   : > { %2655 = vrcp.f32 %v902_v24 }
 0x215   : > { %v905_v25 = vpop.xlane.xlu1 %904  ;;  %v908_v26 = vpop.xlane.xlu0 %907 }
 0x216   : > { %2657 = vrcp.f32 %v905_v25  ;;  %v1621_v25 = vld [vmem:[%s456_s26] sm:$0xff] }
 0x217   : > { %2659 = vrcp.f32 %v908_v26 }
 0x219   : > { %v911_v27 = vpop.xlane.xlu1 %910  ;;  %v914_v28 = vpop.xlane.xlu0 %913 }
 0x21a   : > { %2661 = vrcp.f32 %v911_v27 }
 0x21b   : > { %v2652_v29 = vpop.eup %2651  ;;  %2663 = vrcp.f32 %v914_v28 }
 0x21c   : > { %v926_v30 = vmul.f32 %v2652_v29, %v2636_v0  ;;  %v1274_v0 = vld [vmem:[%s3415_s4 + $0x40] sm:$0xff]  ;;  %v1712_v29 = vld [vmem:[%s3419_s8 + $0x170] sm:$0xff] }
 0x21d   : > { %v917_v31 = vpop.xlane.xlu1 %916 }
 0x21e   : > { %2665 = vrcp.f32 %v917_v31  ;;  %2455 = vmatprep.mubr.msk.f32.mxu0 %vm845_vm1, %v926_v30  ;;  %v1711_v30 = vld [vmem:[%s3419_s8 + $0x168] sm:$0xff]  ;;  %v1713_v31 = vld [vmem:[%s3419_s8 + $0x178] sm:$0xff] }
 0x21f   : > { %v2654_v32 = vpop.eup %2653 }
 0x220   : > { %v2656_v33 = vpop.eup %2655  ;;  %v927_v34 = vmul.f32 %v2654_v32, %v2640_v3  ;;  %v1709_v32 = vld [vmem:[%s3419_s8 + $0x158] sm:$0xff] }
 0x221   : > { %v928_v35 = vmul.f32 %v2656_v33, %v2638_v2  ;;  %v1708_v33 = vld [vmem:[%s3419_s8 + $0x150] sm:$0xff] }
 0x222   : > { %2456 = vmatmul.mubr.msk.f32.vlgmr.msra.gmra.mxu0 %vm845_vm1, %v927_v34  ;;  %v1710_v34 = vld [vmem:[%s3419_s8 + $0x160] sm:$0xff] }
 0x223   : > { %v2658_v37 = vpop.eup %2657  ;;  %2462 = vmatprep.mubr.msk.f32.mxu1 %vm845_vm1, %v928_v35  ;;  %2466 = vmatpush3.msra.mxu0 %v939_v20  ;;  %v1706_v35 = vld [vmem:[%s3419_s8 + $0x140] sm:$0xff] }
 0x224   : > { %v2660_v39 = vpop.eup %2659  ;;  %v929_v40 = vmul.f32 %v2658_v37, %v2932_v6  ;;  %2467 = vmatprep.subr.mxu0 %v938_v36  ;;  %v1278_v6 = vld [vmem:[%s3415_s4 + $0x60] sm:$0xff]  ;;  %v1705_v37 = vld [vmem:[%s3419_s8 + $0x138] sm:$0xff] }
 0x225   : > { %v930_v41 = vmul.f32 %v2660_v39, %v2934_v7  ;;  %2468 = vmatpush3.msra.mxu0 %v938_v36  ;;  %v1707_v36 = vld [vmem:[%s3419_s8 + $0x148] sm:$0xff] }
 0x226   : > { %2463 = vmatmul.mubr.msk.f32.vlgmr.msra.gmra.mxu1 %vm845_vm1, %v929_v40  ;;  %2479 = vmatprep.subr.mxu0 %v1269_v38 }
 0x227   : > { %v2662_v43 = vpop.eup %2661  ;;  %2469 = vmatprep.mubr.msk.f32.mxu0 %vm845_vm1, %v930_v41  ;;  %2473 = vmatpush3.msra.mxu1 %v941_v21 }
 0x228   : > { %v2664_v44 = vpop.eup %2663  ;;  %v931_v45 = vmul.f32 %v2662_v43, %v2940_v10  ;;  %2474 = vmatprep.subr.mxu1 %v940_v42 }
 0x229   : > { %v932_v46 = vmul.f32 %v2664_v44, %v2942_v11  ;;  %2475 = vmatpush3.msra.mxu1 %v940_v42 }
 0x22a   : > { %2470 = vmatmul.mubr.msk.f32.vlgmr.msra.gmra.mxu0 %vm845_vm1, %v931_v45  ;;  %2490 = vmatprep.subr.mxu1 %v1273_v51 }
 0x22b   : > { %v2666_v48 = vpop.eup %2665  ;;  %2476 = vmatprep.mubr.msk.f32.mxu1 %vm845_vm1, %v932_v46  ;;  %2480 = vmatpush3.msra.mxu0 %v1269_v38  ;;  %v1703_v46 = vld [vmem:[%s3419_s8 + $0x128] sm:$0xff] }
 0x22c   : > { %v933_v49 = vmul.f32 %v2666_v48, %v2948_v14  ;;  %2481 = vmatprep.subr.mxu0 %v1268_v47  ;;  %v1704_v48 = vld [vmem:[%s3419_s8 + $0x130] sm:$0xff] }
 0x22d   : > { %2482 = vmatpush3.msra.mxu0 %v1268_v47  ;;  %v1702_v47 = vld [vmem:[%s3419_s8 + $0x120] sm:$0xff] }
 0x22e   : > { %2477 = vmatmul.mubr.msk.f32.vlgmr.msra.gmra.mxu1 %vm845_vm1, %v933_v49  ;;  %2483 = vmatprep.subr.mxu0 %v1267_v50  ;;  %v1700_v49 = vld [vmem:[%s3419_s8 + $0x110] sm:$0xff] }
 0x22f   : > { %2484 = vmatpush3.msra.mxu0 %v1267_v50  ;;  %2491 = vmatpush3.msra.mxu1 %v1273_v51  ;;  %v1699_v50 = vld [vmem:[%s3419_s8 + $0x108] sm:$0xff]  ;;  %v1701_v51 = vld [vmem:[%s3419_s8 + $0x118] sm:$0xff] }
 0x230   : > { %2485 = vmatprep.subr.mxu0 %v1266_v52  ;;  %2492 = vmatprep.subr.mxu1 %v1272_v53 }
 0x231   : > { %2486 = vmatpush3.msra.mxu0 %v1266_v52  ;;  %2493 = vmatpush3.msra.mxu1 %v1272_v53  ;;  %v1697_v52 = vld [vmem:[%s3419_s8 + $0xf8] sm:$0xff]  ;;  %v1696_v53 = vld [vmem:[%s3419_s8 + $0xf0] sm:$0xff] }
 0x232   : > { %2494 = vmatprep.subr.mxu1 %v1271_v54  ;;  %2501 = vmatprep.subr.mxu0 %v1277_v55 }
 0x233   : > { %2495 = vmatpush3.msra.mxu1 %v1271_v54  ;;  %v1698_v54 = vld [vmem:[%s3419_s8 + $0x100] sm:$0xff] }
 0x234   : > { %2496 = vmatprep.subr.mxu1 %v1270_v56 }
 0x235   : > { %2497 = vmatpush3.msra.mxu1 %v1270_v56  ;;  %v1693_v56 = vld [vmem:[%s3419_s8 + $0xd8] sm:$0xff] }
 0x236   : > { %2512 = vmatprep.subr.mxu1 %v1281_v57 }
 0x2e2   : > { %v2457_v58 = vpop.f32.mrf.mxu0 }
 0x2e4   : > { %v1014_v59 = vpop.f32.mrf.mxu0 }
 0x2e5   : > { %2487 = vmatprep.mubr.msk.f32.mxu0 %vm496_vm0, %v1014_v59  ;;  %v1690_v59 = vld [vmem:[%s3419_s8 + $0xc0] sm:$0xff] }
 0x2e6   : > { %v2464_v61 = vpop.f32.mrf.mxu1  ;;  %2488 = vmatmul.mubr.msk.f32.vlgmr.msra.gmra.mxu0 %vm496_vm0, %v2457_v58  ;;  %v1691_v58 = vld [vmem:[%s3419_s8 + $0xc8] sm:$0xff] }
 0x2e7   : > { %2502 = vmatpush3.msra.mxu0 %v1277_v55  ;;  %v1694_v55 = vld [vmem:[%s3419_s8 + $0xe0] sm:$0xff] }
 0x2e8   : > { %v1095_v63 = vpop.f32.mrf.mxu1  ;;  %2503 = vmatprep.subr.mxu0 %v1276_v60 }
 0x2e9   : > { %2498 = vmatprep.mubr.msk.f32.mxu1 %vm496_vm0, %v1095_v63  ;;  %2504 = vmatpush3.msra.mxu0 %v1276_v60  ;;  %v1692_v60 = vld [vmem:[%s3419_s8 + $0xd0] sm:$0xff]  ;;  %v1689_v63 = vld [vmem:[%s3419_s8 + $0xb8] sm:$0xff] }
 0x2ea   : > { %v2471_v2 = vpop.f32.mrf.mxu0  ;;  %2499 = vmatmul.mubr.msk.f32.vlgmr.msra.gmra.mxu1 %vm496_vm0, %v2464_v61  ;;  %2505 = vmatprep.subr.mxu0 %v1275_v62  ;;  %v1688_v61 = vld [vmem:[%s3419_s8 + $0xb0] sm:$0xff] }
 0x2eb   : > { %2506 = vmatpush3.msra.mxu0 %v1275_v62  ;;  %2513 = vmatpush3.msra.mxu1 %v1281_v57  ;;  %v1695_v57 = vld [vmem:[%s3419_s8 + $0xe8] sm:$0xff] }
 0x2ec   : > { %v1176_v3 = vpop.f32.mrf.mxu0  ;;  %2507 = vmatprep.subr.mxu0 %v1274_v0  ;;  %2514 = vmatprep.subr.mxu1 %v1280_v1  ;;  %v1687_v62 = vld [vmem:[%s3419_s8 + $0xa8] sm:$0xff] }
 0x2ed   : > { %2508 = vmatpush3.msra.mxu0 %v1274_v0  ;;  %2509 = vmatprep.mubr.msk.f32.mxu0 %vm496_vm0, %v1176_v3  ;;  %v1685_v0 = vld [vmem:[%s3419_s8 + $0x98] sm:$0xff]  ;;  %v1682_v3 = vld [vmem:[%s3419_s8 + $0x80] sm:$0xff] }
 0x2ee   : > { %2515 = vmatpush3.msra.mxu1 %v1280_v1  ;;  %v2478_v5 = vpop.f32.mrf.mxu1  ;;  %2510 = vmatmul.mubr.msk.f32.vlgmr.msra.gmra.mxu0 %vm496_vm0, %v2471_v2  ;;  %v1684_v1 = vld [vmem:[%s3419_s8 + $0x90] sm:$0xff]  ;;  %v1686_v2 = vld [vmem:[%s3419_s8 + $0xa0] sm:$0xff] }
 0x2ef   : > { %2516 = vmatprep.subr.mxu1 %v1279_v4  ;;  %1731 = vmatprep.subr.mxu0 %v1712_v29 }
 0x2f0   : > { %2517 = vmatpush3.msra.mxu1 %v1279_v4  ;;  %v1257_v7 = vpop.f32.mrf.mxu1  ;;  %1732 = vmatpush1.msra.mxu0 %v1711_v30  ;;  %v1681_v4 = vld [vmem:[%s3419_s8 + $0x78] sm:$0xff] }
 0x2f1   : > { %2518 = vmatprep.subr.mxu1 %v1278_v6  ;;  %2520 = vmatprep.mubr.msk.f32.mxu1 %vm496_vm0, %v1257_v7  ;;  %v1678_v7 = vld [vmem:[%s3419_s8 + $0x60] sm:$0xff] }
 0x2f2   : > { %2519 = vmatpush3.msra.mxu1 %v1278_v6  ;;  %1733 = vmatprep.subr.mxu0 %v1709_v32  ;;  %v1679_v6 = vld [vmem:[%s3419_s8 + $0x68] sm:$0xff] }
 0x2f3   : > { %2521 = vmatmul.mubr.msk.f32.vlgmr.msra.gmra.mxu1 %vm496_vm0, %v2478_v5  ;;  %2523 = vmatprep.subr.mxu1 %v1713_v31  ;;  %v1683_v5 = vld [vmem:[%s3419_s8 + $0x88] sm:$0xff] }
 0x2f4   : > { %2524 = vmatpush3.msra.mxu1 %v1713_v31  ;;  %1734 = vmatpush1.msra.mxu0 %v1708_v33  ;;  %v2280_v33 = vld [vmem:[%s3417_s6] ss:$0 sm:$0xff] }
 0x2f5   : > { %2525 = vmatprep.subr.mxu1 %v1710_v34  ;;  %1735 = vmatprep.subr.mxu0 %v1706_v35 }
 0x2f6   : > { %2526 = vmatpush3.msra.mxu1 %v1710_v34  ;;  %1736 = vmatpush1.msra.mxu0 %v1705_v37 }
 0x2f7   : > { %2527 = vmatprep.subr.mxu1 %v1707_v36  ;;  %1737 = vmatprep.subr.mxu0 %v1703_v46  ;;  %v1958_v46 = vld [vmem:[%s3421_s10 + $0x168] sm:$0xff] }
 0x2f8   : > { %2528 = vmatpush3.msra.mxu1 %v1707_v36  ;;  %1738 = vmatpush1.msra.mxu0 %v1702_v47  ;;  %v1942_v47 = vld [vmem:[%s3421_s10 + $0xe8] sm:$0xff] }
 0x2f9   : > { %2529 = vmatprep.subr.mxu1 %v1704_v48  ;;  %1739 = vmatprep.subr.mxu0 %v1700_v49  ;;  %v1941_v49 = vld [vmem:[%s3421_s10 + $0xe0] sm:$0xff] }
 0x2fa   : > { %2530 = vmatpush3.msra.mxu1 %v1704_v48  ;;  %1740 = vmatpush1.msra.mxu0 %v1699_v50  ;;  %v1926_v48 = vld [vmem:[%s3421_s10 + $0x68] sm:$0xff]  ;;  %v1925_v50 = vld [vmem:[%s3421_s10 + $0x60] sm:$0xff] }
 0x2fb   : > { %2531 = vmatprep.subr.mxu1 %v1701_v51  ;;  %1741 = vmatprep.subr.mxu0 %v1697_v52  ;;  %v1940_v52 = vld [vmem:[%s3421_s10 + $0xd8] sm:$0xff] }
 0x2fc   : > { %2532 = vmatpush3.msra.mxu1 %v1701_v51  ;;  %1742 = vmatpush1.msra.mxu0 %v1696_v53  ;;  %v1957_v51 = vld [vmem:[%s3421_s10 + $0x160] sm:$0xff]  ;;  %v1924_v53 = vld [vmem:[%s3421_s10 + $0x58] sm:$0xff] }
 0x2fd   : > { %2533 = vmatprep.subr.mxu1 %v1698_v54  ;;  %1743 = vmatprep.subr.mxu0 %v1694_v55  ;;  %v1939_v55 = vld [vmem:[%s3421_s10 + $0xd0] sm:$0xff] }
 0x2fe   : > { %2534 = vmatpush3.msra.mxu1 %v1698_v54  ;;  %1744 = vmatpush1.msra.mxu0 %v1693_v56  ;;  %v1956_v54 = vld [vmem:[%s3421_s10 + $0x158] sm:$0xff]  ;;  %v1923_v56 = vld [vmem:[%s3421_s10 + $0x50] sm:$0xff] }
 0x2ff   : > { %2535 = vmatprep.subr.mxu1 %v1695_v57  ;;  %1745 = vmatprep.subr.mxu0 %v1691_v58  ;;  %v1938_v58 = vld [vmem:[%s3421_s10 + $0xc8] sm:$0xff] }
 0x300   : > { %2536 = vmatpush3.msra.mxu1 %v1695_v57  ;;  %1746 = vmatpush1.msra.mxu0 %v1690_v59  ;;  %v1955_v57 = vld [vmem:[%s3421_s10 + $0x150] sm:$0xff]  ;;  %v1922_v59 = vld [vmem:[%s3421_s10 + $0x48] sm:$0xff] }
 0x301   : > { %2537 = vmatprep.subr.mxu1 %v1692_v60  ;;  %1747 = vmatprep.subr.mxu0 %v1688_v61  ;;  %v1937_v61 = vld [vmem:[%s3421_s10 + $0xc0] sm:$0xff] }
 0x302   : > { %2538 = vmatpush3.msra.mxu1 %v1692_v60  ;;  %1748 = vmatpush1.msra.mxu0 %v1687_v62  ;;  %v1954_v60 = vld [vmem:[%s3421_s10 + $0x148] sm:$0xff]  ;;  %v1921_v62 = vld [vmem:[%s3421_s10 + $0x40] sm:$0xff] }
 0x303   : > { %2539 = vmatprep.subr.mxu1 %v1689_v63  ;;  %1749 = vmatprep.subr.mxu0 %v1685_v0  ;;  %v1936_v0 = vld [vmem:[%s3421_s10 + $0xb8] sm:$0xff] }
 0x304   : > { %2540 = vmatpush3.msra.mxu1 %v1689_v63  ;;  %1750 = vmatpush1.msra.mxu0 %v1684_v1  ;;  %v1953_v63 = vld [vmem:[%s3421_s10 + $0x140] sm:$0xff]  ;;  %v1920_v1 = vld [vmem:[%s3421_s10 + $0x38] sm:$0xff] }
 0x305   : > { %2541 = vmatprep.subr.mxu1 %v1686_v2  ;;  %1751 = vmatprep.subr.mxu0 %v1682_v3  ;;  %v1935_v3 = vld [vmem:[%s3421_s10 + $0xb0] sm:$0xff] }
 0x306   : > { %2542 = vmatpush3.msra.mxu1 %v1686_v2  ;;  %1752 = vmatpush1.msra.mxu0 %v1681_v4  ;;  %v1952_v2 = vld [vmem:[%s3421_s10 + $0x138] sm:$0xff]  ;;  %v1919_v4 = vld [vmem:[%s3421_s10 + $0x30] sm:$0xff] }
 0x307   : > { %2543 = vmatprep.subr.mxu1 %v1683_v5  ;;  %1753 = vmatprep.subr.mxu0 %v1679_v6  ;;  %v1934_v6 = vld [vmem:[%s3421_s10 + $0xa8] sm:$0xff] }
 0x308   : > { %2544 = vmatpush3.msra.mxu1 %v1683_v5  ;;  %1754 = vmatpush1.msra.mxu0 %v1678_v7  ;;  %v1951_v5 = vld [vmem:[%s3421_s10 + $0x130] sm:$0xff]  ;;  %v1918_v7 = vld [vmem:[%s3421_s10 + $0x28] sm:$0xff] }
 0x3a6   : > { %v2489_v8 = vpop.f32.mrf.mxu0 }
 0x3a8   : > { %v1354_v10 = vpop.f32.mrf.mxu0 }
 0x3aa   : > { %v2500_v9 = vpop.f32.mrf.mxu1 }
 0x3ab   : > { %v1609_v13 = vadd.f32 %v2500_v9, %v2489_v8  ;;  %v1680_v8 = vld [vmem:[%s3419_s8 + $0x70] sm:$0xff] }
 0x3ac   : > { %v1435_v12 = vpop.f32.mrf.mxu1  ;;  %v1676_v9 = vld [vmem:[%s3419_s8 + $0x50] sm:$0xff]  ;;  %2545 = vmatprep.subr.mxu1 %v1680_v8 }
 0x3ad   : > { %v1606_v15 = vadd.f32 %v1435_v12, %v1354_v10  ;;  %v1675_v10 = vld [vmem:[%s3419_s8 + $0x48] sm:$0xff]  ;;  %v1673_v12 = vld [vmem:[%s3419_s8 + $0x38] sm:$0xff]  ;;  %1755 = vmatprep.subr.mxu0 %v1676_v9  ;;  %2546 = vmatpush3.msra.mxu1 %v1680_v8  ;;  %v1933_v9 = vld [vmem:[%s3421_s10 + $0xa0] sm:$0xff] }
 0x3ae   : > { %v2511_v11 = vpop.f32.mrf.mxu0  ;;  %1756 = vmatpush1.msra.mxu0 %v1675_v10  ;;  %v1950_v8 = vld [vmem:[%s3421_s10 + $0x128] sm:$0xff]  ;;  %v1917_v10 = vld [vmem:[%s3421_s10 + $0x20] sm:$0xff] }
 0x3af   : > { %v1610_v16 = vadd.f32 %v2511_v11, %v1609_v13  ;;  %v1677_v11 = vld [vmem:[%s3419_s8 + $0x58] sm:$0xff]  ;;  %v1672_v13 = vld [vmem:[%s3419_s8 + $0x30] sm:$0xff]  ;;  %1757 = vmatprep.subr.mxu0 %v1673_v12 }
 0x3b0   : > { %v1516_v14 = vpop.f32.mrf.mxu0  ;;  %2547 = vmatprep.subr.mxu1 %v1677_v11  ;;  %1758 = vmatpush1.msra.mxu0 %v1672_v13  ;;  %v1932_v12 = vld [vmem:[%s3421_s10 + $0x98] sm:$0xff] }
 0x3b1   : > { %v1607_v19 = vadd.f32 %v1606_v15, %v1516_v14  ;;  %v1674_v14 = vld [vmem:[%s3419_s8 + $0x40] sm:$0xff]  ;;  %2548 = vmatpush3.msra.mxu1 %v1677_v11  ;;  %v1916_v13 = vld [vmem:[%s3421_s10 + $0x18] sm:$0xff] }
 0x3b2   : > { %v1670_v15 = vld [vmem:[%s3419_s8 + $0x20] sm:$0xff]  ;;  %2549 = vmatprep.subr.mxu1 %v1674_v14 }
 0x3b3   : > { %v2522_v17 = vpop.f32.mrf.mxu1  ;;  %1759 = vmatprep.subr.mxu0 %v1670_v15  ;;  %2550 = vmatpush3.msra.mxu1 %v1674_v14  ;;  %v1949_v11 = vld [vmem:[%s3421_s10 + $0x120] sm:$0xff]  ;;  %v1948_v14 = vld [vmem:[%s3421_s10 + $0x118] sm:$0xff]  ;;  %v1931_v15 = vld [vmem:[%s3421_s10 + $0x90] sm:$0xff] }
 0x3b4   : > { %v1611_v20 = vadd.f32 %v2522_v17, %v1610_v16  ;;  %v1669_v16 = vld [vmem:[%s3419_s8 + $0x18] sm:$0xff]  ;;  %v1671_v17 = vld [vmem:[%s3419_s8 + $0x28] sm:$0xff] }
 0x3b5   : > { %v1597_v21 = vpop.f32.mrf.mxu1  ;;  %1760 = vmatpush1.msra.mxu0 %v1669_v16  ;;  %2551 = vmatprep.subr.mxu1 %v1671_v17  ;;  %v1915_v16 = vld [vmem:[%s3421_s10 + $0x10] sm:$0xff] }
 0x3b6   : > { %v1620_v23 = vadd.f32 %v2279_v18, %v1611_v20  ;;  %v1608_v24 = vadd.f32 %v1607_v19, %v1597_v21  ;;  %v1666_v19 = vld [vmem:[%s3419_s8] sm:$0xff]  ;;  %v1668_v20 = vld [vmem:[%s3419_s8 + $0x10] sm:$0xff]  ;;  %2552 = vmatpush3.msra.mxu1 %v1671_v17  ;;  %v2745_v21 = vmov 0.0  }
 0x3b7   : > { %1795 = vmatprep.mubr.f32.mxu0 %v2745_v21  ;;  %2553 = vmatprep.subr.mxu1 %v1668_v20  ;;  %v1947_v17 = vld [vmem:[%s3421_s10 + $0x110] sm:$0xff] }
 0x3b8   : > { %v1619_v26 = vadd.f32 %v2279_v18, %v1608_v24  ;;  %v3042_v27 = vadd.f32 %v1622_v22, %v1620_v23  ;;  %v1667_v18 = vld [vmem:[%s3419_s8 + $0x8] sm:$0xff]  ;;  %2554 = vmatpush3.msra.mxu1 %v1668_v20  ;;  %v1944_v22 = vld [vmem:[%s3421_s10 + $0xf8] sm:$0xff] }
 0x3b9   : > { %1761 = vmatprep.subr.mxu0 %v1667_v18  ;;  %v1960_v23 = vld [vmem:[%s3421_s10 + $0x178] sm:$0xff]  ;;  %v1930_v18 = vld [vmem:[%s3421_s10 + $0x88] sm:$0xff] }
 0x3ba   : > { %1629 = vadd.xlane.f32.xlu1 %v3042_v27  ;;  %v3045_v28 = vadd.f32 %v1621_v25, %v1619_v26  ;;  %1762 = vmatpush1.msra.mxu0 %v1666_v19  ;;  %v1914_v19 = vld [vmem:[%s3421_s10 + $0x8] sm:$0xff] }
 0x3bb   : > { %2367 = vmatprep.subr.mxu0 %v1944_v22  ;;  %2558 = vmatprep.subr.mxu1 %v1960_v23  ;;  %v1946_v20 = vld [vmem:[%s3421_s10 + $0x108] sm:$0xff]  ;;  %v1913_v22 = vld [vmem:[%s3421_s10] sm:$0xff] }
 0x3bc   : > { %1627 = vadd.xlane.f32.xlu0 %v3045_v28 }
 0x443   : > { %v1630_v38 = vpop.xlane.xlu1 %1629 }
 0x444   : > { %v1633_v39 = vmul.f32 0.0078125, %v1630_v38  ;;  %v2281_v38 = vld [vmem:[%s3418_s7] ss:$0 sm:$0xff] }
 0x445   : > { %v1628_v40 = vpop.xlane.xlu0 %1627 }
 0x446   : > { %v3076_v41 = vsub.f32 %v3042_v27, %v1633_v39  ;;  %v1632_v42 = vmul.f32 0.0078125, %v1628_v40 }
 0x448   : > { %v3079_v43 = vsub.f32 %v3045_v28, %v1632_v42  ;;  %v1637_v44 = vmul.f32 %v3076_v41, %v3076_v41 }
 0x44a   : > { %1640 = vadd.xlane.f32.xlu1 %v1637_v44  ;;  %v1636_v45 = vmul.f32 %v3079_v43, %v3079_v43  ;;  %v1928_v44 = vld [vmem:[%s3421_s10 + $0x78] sm:$0xff] }
 0x44c   : > { %1638 = vadd.xlane.f32.xlu0 %v1636_v45  ;;  %v1927_v45 = vld [vmem:[%s3421_s10 + $0x70] sm:$0xff] }
 0x4d3   : > { %v1641_v24 = vpop.xlane.xlu1 %1640 }
 0x4d4   : > { %v1643_v25 = vmul.f32 0.0078125, %v1641_v24  ;;  %v1716_v24 = vlaneseq }
 0x4d5   : > { %v1639_v26 = vpop.xlane.xlu0 %1638 }
 0x4d6   : > { %v1645_v29 = vadd.f32 1e-06, %v1643_v25  ;;  %v1642_v30 = vmul.f32 0.0078125, %v1639_v26  ;;  %v1717_v25 = vshrl.u32 %v1716_v24, 7 }
 0x4d8   : > { %2667 = vrsqrt.f32 %v1645_v29  ;;  %v1644_v31 = vadd.f32 1e-06, %v1642_v30  ;;  %v1718_v26 = vsub.s32 0, %v1717_v25  ;;  %v1714_v29 = vld [vmem:[%s3420_s9] sm:$0x7]  ;;  %v1726_v30 = vsub.s32 2, %v1717_v25 }
 0x4da   : > { %2669 = vrsqrt.f32 %v1644_v31  ;;  %v1722_v31 = vsub.s32 1, %v1717_v25 }
 0x4e5   : > { %v2668_v32 = vpop.eup %2667 }
 0x4e6   : > { %v1649_v34 = vmul.f32 %v2668_v32, %v3076_v41  ;;  %v1943_v41 = vld [vmem:[%s3421_s10 + $0xf0] sm:$0xff]  ;;  %v1719_v32 = vrot.slane %v1714_v29, %v1718_v26 }
 0x4e7   : > { %v2670_v35 = vpop.eup %2669 }
 0x4e8   : > { %v1648_v36 = vmul.f32 %v2670_v35, %v3079_v43  ;;  %v1657_v37 = vmul.f32 %v2280_v33, %v1649_v34  ;;  %v1959_v43 = vld [vmem:[%s3421_s10 + $0x170] sm:$0xff]  ;;  %v1723_v34 = vrot.slane %v1714_v29, %v1722_v31 }
 0x4ea   : > { %v1656_v39 = vmul.f32 %v2280_v33, %v1648_v36  ;;  %v1665_v42 = vadd.f32 %v2281_v38, %v1657_v37  ;;  %v1727_v33 = vrot.slane %v1714_v29, %v1726_v30 }
 0x4ec   : > { %v1664_v40 = vadd.f32 %v2281_v38, %v1656_v39 }
 0x4ee   : > { %1796 = vmatmul.mubr.f32.vlgmr.msra.gmra.mxu0 %v1664_v40  ;;  %2555 = vmatprep.mubr.f32.mxu1 %v1664_v40 }
 0x4ef   : > { %2556 = vmatmul.mubr.f32.vlgmr.msra.gmra.mxu1 %v1665_v42  ;;  %1801 = vmatprep.mubr.f32.mxu0 %v2745_v21  ;;  %v1929_v21 = vld [vmem:[%s3421_s10 + $0x80] sm:$0xff] }
 0x4f0   : > { %2368 = vmatpush3.msra.mxu0 %v1928_v44  ;;  %2559 = vmatpush3.msra.mxu1 %v1960_v23  ;;  %v1945_v23 = vld [vmem:[%s3421_s10 + $0x100] sm:$0xff] }
 0x4f1   : > { %2369 = vmatprep.subr.mxu0 %v1943_v41  ;;  %2560 = vmatprep.subr.mxu1 %v1959_v43 }
 0x4f2   : > { %1802 = vmatmul.mubr.f32.gmra.mxu0 %v1665_v42  ;;  %2561 = vmatpush3.msra.mxu1 %v1959_v43 }
 0x4f3   : > { %2370 = vmatpush3.msra.mxu0 %v1927_v45  ;;  %2562 = vmatprep.subr.mxu1 %v1958_v46 }
 0x4f4   : > { %2371 = vmatprep.subr.mxu0 %v1942_v47  ;;  %2563 = vmatpush3.msra.mxu1 %v1958_v46 }
 0x4f5   : > { %2372 = vmatpush3.msra.mxu0 %v1926_v48  ;;  %2564 = vmatprep.subr.mxu1 %v1957_v51 }
 0x4f6   : > { %2373 = vmatprep.subr.mxu0 %v1941_v49  ;;  %2565 = vmatpush3.msra.mxu1 %v1957_v51 }
 0x4f7   : > { %2374 = vmatpush3.msra.mxu0 %v1925_v50  ;;  %2566 = vmatprep.subr.mxu1 %v1956_v54 }
 0x4f8   : > { %2375 = vmatprep.subr.mxu0 %v1940_v52  ;;  %2567 = vmatpush3.msra.mxu1 %v1956_v54 }
 0x4f9   : > { %2376 = vmatpush3.msra.mxu0 %v1924_v53  ;;  %2568 = vmatprep.subr.mxu1 %v1955_v57 }
 0x4fa   : > { %2377 = vmatprep.subr.mxu0 %v1939_v55  ;;  %2569 = vmatpush3.msra.mxu1 %v1955_v57 }
 0x4fb   : > { %2378 = vmatpush3.msra.mxu0 %v1923_v56  ;;  %2570 = vmatprep.subr.mxu1 %v1954_v60 }
 0x4fc   : > { %2379 = vmatprep.subr.mxu0 %v1938_v58  ;;  %2571 = vmatpush3.msra.mxu1 %v1954_v60 }
 0x4fd   : > { %2380 = vmatpush3.msra.mxu0 %v1922_v59  ;;  %2572 = vmatprep.subr.mxu1 %v1953_v63 }
 0x4fe   : > { %2381 = vmatprep.subr.mxu0 %v1937_v61  ;;  %2573 = vmatpush3.msra.mxu1 %v1953_v63 }
 0x4ff   : > { %2382 = vmatpush3.msra.mxu0 %v1921_v62  ;;  %2574 = vmatprep.subr.mxu1 %v1952_v2 }
 0x500   : > { %2383 = vmatprep.subr.mxu0 %v1936_v0  ;;  %2575 = vmatpush3.msra.mxu1 %v1952_v2 }
 0x501   : > { %2384 = vmatpush3.msra.mxu0 %v1920_v1  ;;  %2576 = vmatprep.subr.mxu1 %v1951_v5 }
 0x502   : > { %2385 = vmatprep.subr.mxu0 %v1935_v3  ;;  %2577 = vmatpush3.msra.mxu1 %v1951_v5 }
 0x503   : > { %2386 = vmatpush3.msra.mxu0 %v1919_v4  ;;  %2578 = vmatprep.subr.mxu1 %v1950_v8 }
 0x504   : > { %2387 = vmatprep.subr.mxu0 %v1934_v6  ;;  %2579 = vmatpush3.msra.mxu1 %v1950_v8 }
 0x505   : > { %2388 = vmatpush3.msra.mxu0 %v1918_v7  ;;  %2580 = vmatprep.subr.mxu1 %v1949_v11 }
 0x506   : > { %2389 = vmatprep.subr.mxu0 %v1933_v9  ;;  %2581 = vmatpush3.msra.mxu1 %v1949_v11 }
 0x507   : > { %2390 = vmatpush3.msra.mxu0 %v1917_v10  ;;  %2582 = vmatprep.subr.mxu1 %v1948_v14 }
 0x508   : > { %2391 = vmatprep.subr.mxu0 %v1932_v12  ;;  %2583 = vmatpush3.msra.mxu1 %v1948_v14 }
 0x509   : > { %2392 = vmatpush3.msra.mxu0 %v1916_v13  ;;  %2584 = vmatprep.subr.mxu1 %v1947_v17 }
 0x50a   : > { %2393 = vmatprep.subr.mxu0 %v1931_v15  ;;  %2585 = vmatpush3.msra.mxu1 %v1947_v17 }
 0x50b   : > { %2394 = vmatpush3.msra.mxu0 %v1915_v16  ;;  %2586 = vmatprep.subr.mxu1 %v1946_v20  ;;  %v2282_v16 = vld [vmem:[%s3422_s11] ss:$0 sm:$0xff] }
 0x50c   : > { %2395 = vmatprep.subr.mxu0 %v1930_v18  ;;  %2587 = vmatpush3.msra.mxu1 %v1946_v20 }
 0x50d   : > { %2396 = vmatpush3.msra.mxu0 %v1914_v19  ;;  %2588 = vmatprep.subr.mxu1 %v1945_v23 }
 0x50e   : > { %2397 = vmatprep.subr.mxu0 %v1929_v21  ;;  %2589 = vmatpush3.msra.mxu1 %v1945_v23 }
 0x50f   : > { %2398 = vmatpush3.msra.mxu0 %v1913_v22 }
 0x5ae   : > { %v1797_v35 = vpop.f32.mrf.mxu0 }
 0x5af   : > { %v1798_v36 = vadd.f32 %v1797_v35, %v1719_v32  ;;  %v2557_v37 = vpop.f32.mrf.mxu1 }
 0x5b0   : > { %v1880_v38 = vadd.f32 %v2557_v37, %v1727_v33  ;;  %v1799_v39 = vpop.f32.mrf.mxu0 }
 0x5b1   : > { %v1889_v40 = vmul.f32 0.70710677, %v1798_v36  ;;  %v1800_v42 = vadd.f32 %v1799_v39, %v1723_v34  ;;  %v1874_v44 = vpop.f32.mrf.mxu1  ;;  %v1883_v62 = vmul.f32 0.5, %v1798_v36 }
 0x5b2   : > { %v1894_v41 = vmul.f32 0.70710677, %v1880_v38  ;;  %v1875_v43 = vadd.f32 %v1874_v44, %v1727_v33  ;;  %v1803_v45 = vpop.f32.mrf.mxu0  ;;  %v1888_v1 = vmul.f32 0.5, %v1880_v38 }
 0x5b3   : > { %2671 = verf.f32 %v1889_v40  ;;  %v1890_v46 = vmul.f32 0.70710677, %v1800_v42  ;;  %v1804_v47 = vadd.f32 %v1803_v45, %v1719_v32  ;;  %v1884_v59 = vmul.f32 0.5, %v1800_v42 }
 0x5b4   : > { %2673 = verf.f32 %v1894_v41  ;;  %v1891_v48 = vmul.f32 0.70710677, %v1875_v43  ;;  %v1805_v49 = vpop.f32.mrf.mxu0  ;;  %v1885_v63 = vmul.f32 0.5, %v1875_v43 }
 0x5b5   : > { %2675 = verf.f32 %v1890_v46  ;;  %v1892_v50 = vmul.f32 0.70710677, %v1804_v47  ;;  %v1806_v51 = vadd.f32 %v1805_v49, %v1723_v34  ;;  %v1886_v10 = vmul.f32 0.5, %v1804_v47 }
 0x5b6   : > { %2677 = verf.f32 %v1891_v48 }
 0x5b7   : > { %2679 = verf.f32 %v1892_v50  ;;  %v1893_v52 = vmul.f32 0.70710677, %v1806_v51  ;;  %v1887_v8 = vmul.f32 0.5, %v1806_v51 }
 0x5b9   : > { %2681 = verf.f32 %v1893_v52 }
 0x5c0   : > { %v2672_v53 = vpop.eup %2671 }
 0x5c1   : > { %v2674_v54 = vpop.eup %2673  ;;  %v1901_v56 = vadd.f32 1.0, %v2672_v53 }
 0x5c2   : > { %v2676_v55 = vpop.eup %2675  ;;  %v1906_v58 = vadd.f32 1.0, %v2674_v54 }
 0x5c3   : > { %v2678_v57 = vpop.eup %2677  ;;  %v1902_v60 = vadd.f32 1.0, %v2676_v55  ;;  %v1907_v4 = vmul.f32 %v1901_v56, %v1883_v62 }
 0x5c4   : > { %v2680_v61 = vpop.eup %2679  ;;  %v1903_v0 = vadd.f32 1.0, %v2678_v57  ;;  %v1912_v7 = vmul.f32 %v1906_v58, %v1888_v1 }
 0x5c5   : > { %v1908_v2 = vmul.f32 %v1902_v60, %v1884_v59  ;;  %v1904_v6 = vadd.f32 1.0, %v2680_v61 }
 0x5c6   : > { %v2682_v3 = vpop.eup %2681  ;;  %v1909_v5 = vmul.f32 %v1903_v0, %v1885_v63 }
 0x5c7   : > { %2032 = vmatprep.mubr.f32.mxu0 %v1908_v2  ;;  %v1905_v9 = vadd.f32 1.0, %v2682_v3  ;;  %v1910_v12 = vmul.f32 %v1904_v6, %v1886_v10 }
 0x5c8   : > { %2033 = vmatmul.mubr.f32.vlgmr.msra.gmra.mxu0 %v1907_v4  ;;  %2590 = vmatprep.mubr.f32.mxu1 %v1909_v5 }
 0x5c9   : > { %2591 = vmatmul.mubr.f32.vlgmr.msra.gmra.mxu1 %v1912_v7  ;;  %v1911_v11 = vmul.f32 %v1905_v9, %v1887_v8 }
 0x5cb   : > { %2037 = vmatprep.mubr.f32.mxu0 %v1911_v11 }
 0x5cc   : > { %2038 = vmatmul.mubr.f32.gmra.mxu0 %v1910_v12 }
 0x688   : > { %v2399_v13 = vpop.f32.mrf.mxu0 }
 0x689   : > { %v2592_v14 = vpop.f32.mrf.mxu1 }
 0x68a   : > { %v2400_v15 = vpop.f32.mrf.mxu0 }
 0x68b   : > { %v2401_v17 = vadd.f32 %v2400_v15, %v2399_v13  ;;  %v2109_v20 = vpop.f32.mrf.mxu1 }
 0x68c   : > { %v2402_v18 = vpop.f32.mrf.mxu0 }
 0x68d   : > { %v2035_v19 = vadd.f32 %v2401_v17, %v2282_v16 }
 0x68e   : > { %v2403_v21 = vpop.f32.mrf.mxu0 }
 0x68f   : > { %v2110_v22 = vadd.f32 %v2109_v20, %v2035_v19  ;;  %v2404_v23 = vadd.f32 %v2403_v21, %v2402_v18 }
 0x691   : > { %v2118_v24 = vadd.f32 %v2110_v22, %v3045_v28  ;;  %v2040_v25 = vadd.f32 %v2404_v23, %v2282_v16 }
 0x693   : > { %2120 = vst [vmem:[%s451_s18] sm:$0xff] %v2118_v24  ;;  %v2115_v26 = vadd.f32 %v2592_v14, %v2040_v25 }
 0x695   : > { %v2119_v29 = vadd.f32 %v2115_v26, %v3042_v27 }
 0x697   : > { %2121 = vst [vmem:[%s451_s18 + $0x8] sm:$0xff] %v2119_v29 }
 0x698   : > { %2696 = shalt.err (!%p2693_p3)
}
 0x699   : > { %s2697_s0 = scalar_lea.hbm %s3368_s28, 256  ;;  %s2701_s20 = scalar_lea.hbm %s3423_s12, 512 }
 0x69a   : > { %p2698_p4 = scmp.ne.s32.totalorder %s3368_s28, %s2697_s0  ;;  %p2702_p9 = scmp.lt.s32.totalorder %s3368_s28, %s3423_s12 }
 0x69b   : > { %p2703_p10 = scmp.lt.s32.totalorder %s2701_s20, %s2697_s0 }
 0x69c   : > { %p2699_p7 = pnand %p2698_p4, %p2852_p5 }
 0x69d   : > { %p2704_p11 = por %p2703_p10, %p2702_p9 }
 0x69e   : > { %p2700_p8 = pneg %p2699_p7 }
 0x6a0   : > { %p2705_p12 = pnand %p2704_p11, %p2700_p8 }
 0x6a2   : > { %2708 = shalt.err (!%p2705_p12)
}
 0x6a3   : > { %s2747_s1 = smov 128   ;;  %s2748_s15 = smov 8  }
 0x6a4   : > { %2593 = dma.vmem_to_hbm [thread:$0]  (%p2852_p5), %s3363_s16, 256, %s3368_s28, %s3371_s29, %s2747_s1, %s2747_s1, %s2748_s15  }
 0x6a5 PF: > { %p2599_p13 = scmp.ge.s32.totalorder %s2743_s24, 2  ;;  %s2151_s17 = sand.u32 1, %s2731_s21  }
 0x6a6   : > { %s2152_s0 = scalar_lea.sflag [#allocation3], %s2151_s17 }
 0x6a7   : > { %p2596_p0 = pnand %p2599_p13, %p2856_p6 }
 0x6a9   : > { %p2597_p1 = pneg %p2596_p0 }
 0x6ab   : > { %2726 = dma.done.wait (%p2597_p1), %s2152_s0, 256  }
 0x6ac   : > { %2728 = vsyncadd (%p2597_p1), %s2152_s0, 4294967040  ;;  %p22_p2 = scmp.ge.s32.totalorder %s2839_s27, 4   ;;  %s3430_s21 = smov %s2735_s22 }
 0x6ad   : > { %s3431_s22 = smov %s2739_s23  ;;  %s3432_s23 = smov %s2850_s30 }
 0x6ae   : > { %s3433_s24 = smov %s2839_s27  ;;  %24 = sbr.rel (!%p22_p2) target bundleno = 6 (0x6), region = 112 }
 0x6b3   :  { %2157 = vsyncpa [#allocation3], 1 }
 0x6b4   :  { %2159 = vsyncpa [#allocation3 + $0x1], 1 }

</bundles_post_ra>
